<compile_context>
chip_gen: v7x
topology: tpu7x:2x2x1
jax: 0.10.0
libtpu: 0.0.40
codegen_flags: <defaults>
</compile_context>

<pallas_src>
import jax
import jax.numpy as jnp
from jax.experimental import pallas as pl
from jax.experimental.pallas import tpu as pltpu

NEG_SLOPE = 0.3   # LeakyReLU negative_slope
BN_EPS = 1e-5     # nn.BatchNorm2d default eps


def _lrelu(v):
    return jnp.where(v > 0, v, NEG_SLOPE * v)


def _pw_fma(w, x):
    """1x1 conv as unrolled VPU FMAs: w [Cout, Cin] applied to x [Cin, M]."""
    cin = w.shape[1]
    acc = w[:, 0:1] * x[0:1, :]
    for k in range(1, cin):
        acc = acc + w[:, k:k + 1] * x[k:k + 1, :]
    return acc


def _make_kernel(H, W, PAD):
    M = H * W

    def kernel(x_ref, w1_ref, b1_ref, w2_ref, b2_ref, w3_ref, b3_ref,
               w4_ref, b4_ref, o_ref, ypad_ref):
        x = x_ref[0]                                            # [Cx, M]

        # --- block 1: 1x1 conv (x -> y) + folded BN + LeakyReLU ---
        y1 = _lrelu(_pw_fma(w1_ref[...], x) + b1_ref[...])      # [Cy, M]
        # --- block 2: 1x1 conv (y -> 2y) ---
        y2 = _lrelu(_pw_fma(w2_ref[...], y1) + b2_ref[...])     # [C2, M]

        # --- block 3: grouped 3x3 conv (2y -> 2y, groups=y, pad=1, stride=1) ---
        # Flat zero-padded copy of y2 so every tap is a static shifted slice.
        ypad_ref[...] = jnp.zeros_like(ypad_ref)
        ypad_ref[:, PAD:PAD + M] = y2

        col = jax.lax.broadcasted_iota(jnp.int32, (1, M), 1) % W
        mask_l = col >= 1          # column w-1 exists
        mask_r = col <= W - 2      # column w+1 exists

        acc3 = None
        for kh in range(3):
            for kw in range(3):
                t = kh * 3 + kw
                d = (kh - 1) * W + (kw - 1)
                tap = ypad_ref[:, PAD + d:PAD + d + M]          # [C2, M]
                if kw == 0:
                    tap = jnp.where(mask_l, tap, 0.0)
                elif kw == 2:
                    tap = jnp.where(mask_r, tap, 0.0)
                term = jnp.dot(w3_ref[t], tap,
                               preferred_element_type=jnp.float32)
                acc3 = term if acc3 is None else acc3 + term
        y3 = _lrelu(acc3 + b3_ref[...])                         # [C2, M]

        # --- block 4: 1x1 conv (2y -> x) ---
        y4 = _lrelu(_pw_fma(w4_ref[...], y3) + b4_ref[...])     # [Cx, M]

        # --- residual add, lane-dense store ---
        o_ref[0] = (y4 + x).astype(o_ref.dtype)

    return kernel


def _fold_bn(gamma, beta, mean, var):
    scale = gamma / jnp.sqrt(var + BN_EPS)
    shift = beta - mean * scale
    return scale, shift


def pep_forward(x_nchw, params, y_ch):
    N, Cx, H, W = x_nchw.shape
    M = H * W
    Cy = y_ch
    C2 = 2 * y_ch
    G = y_ch                       # groups of the 3x3 conv
    PAD = max(128, W + 1)          # flat padding; 128 keeps the interior store lane-aligned

    # ---- host-side parameter prep: fold BN (eval mode) + bias into weights ----
    # TODO(synk): BatchNorm is folded with running stats (eval mode); a PyTorch
    #             module in train() mode would use batch statistics instead.
    w1, b1, g1, be1, m1, v1 = params["c1"]
    w2, b2, g2, be2, m2, v2 = params["c2"]
    w3, b3, g3, be3, m3, v3 = params["c3"]
    w4, b4, g4, be4, m4, v4 = params["c4"]

    s1, sh1 = _fold_bn(g1, be1, m1, v1)
    s2, sh2 = _fold_bn(g2, be2, m2, v2)
    s3, sh3 = _fold_bn(g3, be3, m3, v3)
    s4, sh4 = _fold_bn(g4, be4, m4, v4)

    W1f = w1[:, :, 0, 0] * s1[:, None]
    b1f = (b1 * s1 + sh1)[:, None]
    W2f = w2[:, :, 0, 0] * s2[:, None]
    b2f = (b2 * s2 + sh2)[:, None]
    W4f = w4[:, :, 0, 0] * s4[:, None]
    b4f = (b4 * s4 + sh4)[:, None]

    # Grouped 3x3: fold BN, then expand the group structure into dense
    # per-tap [C2, C2] matrices (zeros outside each group's channel block).
    W3f = w3 * s3[:, None, None, None]                 # [C2, C2//G, 3, 3]
    b3f = (b3 * s3 + sh3)[:, None]
    ipg = C2 // G                                      # in-channels per group (=2)
    opg = C2 // G                                      # out-channels per group (=2)
    co = jnp.arange(C2)[:, None, None]
    ci = jnp.arange(ipg)[None, :, None]
    cin = jnp.arange(C2)[None, None, :]
    sel = ((co // opg) * ipg + ci == cin).astype(jnp.float32)   # [C2, ipg, C2]
    W3taps = jnp.einsum("oikl,oic->kloc", W3f, sel).reshape(9, C2, C2)

    xf = x_nchw.reshape(N, Cx, M).astype(jnp.float32)   # pure reshape, no transpose

    out = pl.pallas_call(
        _make_kernel(H, W, PAD),
        out_shape=jax.ShapeDtypeStruct((N, Cx, M), jnp.float32),
        grid=(N,),
        in_specs=[
            pl.BlockSpec((1, Cx, M), lambda n: (n, 0, 0)),      # x (lane-dense)
            pl.BlockSpec((Cy, Cx), lambda n: (0, 0)),           # W1f
            pl.BlockSpec((Cy, 1), lambda n: (0, 0)),            # b1f
            pl.BlockSpec((C2, Cy), lambda n: (0, 0)),           # W2f
            pl.BlockSpec((C2, 1), lambda n: (0, 0)),            # b2f
            pl.BlockSpec((9, C2, C2), lambda n: (0, 0, 0)),     # W3taps (dense)
            pl.BlockSpec((C2, 1), lambda n: (0, 0)),            # b3f
            pl.BlockSpec((Cx, C2), lambda n: (0, 0)),           # W4f
            pl.BlockSpec((Cx, 1), lambda n: (0, 0)),            # b4f
        ],
        out_specs=pl.BlockSpec((1, Cx, M), lambda n: (n, 0, 0)),
        scratch_shapes=[pltpu.VMEM((C2, M + 2 * PAD), jnp.float32)],
        compiler_params=pltpu.CompilerParams(
            dimension_semantics=("parallel",)),
    )(xf, W1f, b1f, W2f, b2f, W3taps, b3f, W4f, b4f)

    return out.reshape(N, Cx, H, W)


# ---------------------------------------------------------------------------
# Pure-JAX reference (lax.conv) for correctness check
# ---------------------------------------------------------------------------
def ref_forward(x_nchw, params, y_ch):
    def block(h, p, pad, groups):
        w, b, g, be, m, v = p
        y = jax.lax.conv_general_dilated(
            h, w, window_strides=(1, 1), padding=((pad, pad), (pad, pad)),
            dimension_numbers=("NCHW", "OIHW", "NCHW"),
            feature_group_count=groups)
        y = y + b[None, :, None, None]
        s, sh = _fold_bn(g, be, m, v)
        y = y * s[None, :, None, None] + sh[None, :, None, None]
        return jnp.where(y > 0, y, NEG_SLOPE * y)

    x = x_nchw.astype(jnp.float32)
    h = block(x, params["c1"], 0, 1)
    h = block(h, params["c2"], 0, 1)
    h = block(h, params["c3"], 1, y_ch)
    h = block(h, params["c4"], 0, 1)
    return h + x


if __name__ == "__main__":
    # pep(x=4, y=8), input NCHW [2, 4, 16, 16]
    x_ch, y_ch = 4, 8
    C2 = 2 * y_ch
    N, H, W = 2, 16, 16

    key = jax.random.PRNGKey(0)
    ks = jax.random.split(key, 13)

    def bn_params(k, c):
        k1, k2, k3, k4 = jax.random.split(k, 4)
        gamma = 1.0 + 0.1 * jax.random.normal(k1, (c,), jnp.float32)
        beta = 0.1 * jax.random.normal(k2, (c,), jnp.float32)
        mean = 0.1 * jax.random.normal(k3, (c,), jnp.float32)
        var = 1.0 + 0.5 * jax.random.uniform(k4, (c,), jnp.float32)
        return gamma, beta, mean, var

    params = {
        "c1": (0.3 * jax.random.normal(ks[0], (y_ch, x_ch, 1, 1), jnp.float32),
               0.1 * jax.random.normal(ks[1], (y_ch,), jnp.float32),
               *bn_params(ks[2], y_ch)),
        "c2": (0.3 * jax.random.normal(ks[3], (C2, y_ch, 1, 1), jnp.float32),
               0.1 * jax.random.normal(ks[4], (C2,), jnp.float32),
               *bn_params(ks[5], C2)),
        "c3": (0.3 * jax.random.normal(ks[6], (C2, 2, 3, 3), jnp.float32),
               0.1 * jax.random.normal(ks[7], (C2,), jnp.float32),
               *bn_params(ks[8], C2)),
        "c4": (0.3 * jax.random.normal(ks[9], (x_ch, C2, 1, 1), jnp.float32),
               0.1 * jax.random.normal(ks[10], (x_ch,), jnp.float32),
               *bn_params(ks[11], x_ch)),
    }

    x = jax.random.normal(ks[12], (N, x_ch, H, W), jnp.float32)

    out = jax.jit(lambda a: pep_forward(a, params, y_ch))(x)
    out = jax.block_until_ready(out)

    ref = ref_forward(x, params, y_ch)
    assert out.shape == ref.shape == (N, x_ch, H, W), (out.shape, ref.shape)
    max_err = float(jnp.max(jnp.abs(out - ref)))
    assert jnp.allclose(out, ref, atol=2e-3, rtol=2e-3), max_err

    print("KERNEL_OK")
</pallas_src>

<mosaic_0001>
module attributes {stable_mosaic.version = 11 : i64} {
  func.func @kernel(%arg0: i32, %arg1: memref<1x4x256xf32, #tpu.memory_space<vmem>>, %arg2: memref<8x4xf32, #tpu.memory_space<vmem>>, %arg3: memref<8x1xf32, #tpu.memory_space<vmem>>, %arg4: memref<16x8xf32, #tpu.memory_space<vmem>>, %arg5: memref<16x1xf32, #tpu.memory_space<vmem>>, %arg6: memref<9x16x16xf32, #tpu.memory_space<vmem>>, %arg7: memref<16x1xf32, #tpu.memory_space<vmem>>, %arg8: memref<4x16xf32, #tpu.memory_space<vmem>>, %arg9: memref<4x1xf32, #tpu.memory_space<vmem>>, %arg10: memref<1x4x256xf32, #tpu.memory_space<vmem>>, %arg11: memref<16x512xf32, #tpu.memory_space<vmem>>) attributes {dimension_semantics = [#tpu.dimension_semantics<parallel>], iteration_bounds = array<i64: 2>, scalar_prefetch = 0 : i64, scratch_operands = 1 : i64, tpu.core_type = #tpu.core_type<tc>, window_params = [{transform_indices = @transform_0, window_bounds = array<i64: 1, 4, 256>}, {pipeline_mode = #tpu.pipeline_mode<synchronous>, transform_indices = @transform_1, window_bounds = array<i64: 8, 4>}, {pipeline_mode = #tpu.pipeline_mode<synchronous>, transform_indices = @transform_2, window_bounds = array<i64: 8, 1>}, {pipeline_mode = #tpu.pipeline_mode<synchronous>, transform_indices = @transform_3, window_bounds = array<i64: 16, 8>}, {pipeline_mode = #tpu.pipeline_mode<synchronous>, transform_indices = @transform_4, window_bounds = array<i64: 16, 1>}, {pipeline_mode = #tpu.pipeline_mode<synchronous>, transform_indices = @transform_5, window_bounds = array<i64: 9, 16, 16>}, {pipeline_mode = #tpu.pipeline_mode<synchronous>, transform_indices = @transform_6, window_bounds = array<i64: 16, 1>}, {pipeline_mode = #tpu.pipeline_mode<synchronous>, transform_indices = @transform_7, window_bounds = array<i64: 4, 16>}, {pipeline_mode = #tpu.pipeline_mode<synchronous>, transform_indices = @transform_8, window_bounds = array<i64: 4, 1>}, {transform_indices = @transform_9, window_bounds = array<i64: 1, 4, 256>}]} {
    %c0 = arith.constant 0 : index
    %c0_0 = arith.constant 0 : index
    %c0_1 = arith.constant 0 : index
    %0 = vector.load %arg1[%c0, %c0_0, %c0_1] : memref<1x4x256xf32, #tpu.memory_space<vmem>>, vector<1x4x256xf32>
    %1 = vector.shape_cast %0 : vector<1x4x256xf32> to vector<4x256xf32>
    %c0_2 = arith.constant 0 : index
    %c0_3 = arith.constant 0 : index
    %2 = vector.load %arg2[%c0_2, %c0_3] : memref<8x4xf32, #tpu.memory_space<vmem>>, vector<8x4xf32>
    %3 = vector.extract_strided_slice %2 {offsets = [0, 0], sizes = [8, 1], strides = [1, 1]} : vector<8x4xf32> to vector<8x1xf32>
    %4 = vector.extract_strided_slice %1 {offsets = [0, 0], sizes = [1, 256], strides = [1, 1]} : vector<4x256xf32> to vector<1x256xf32>
    %5 = vector.broadcast %3 : vector<8x1xf32> to vector<8x256xf32>
    %6 = vector.broadcast %4 : vector<1x256xf32> to vector<8x256xf32>
    %7 = arith.mulf %5, %6 : vector<8x256xf32>
    %8 = vector.extract_strided_slice %2 {offsets = [0, 1], sizes = [8, 1], strides = [1, 1]} : vector<8x4xf32> to vector<8x1xf32>
    %9 = vector.extract_strided_slice %1 {offsets = [1, 0], sizes = [1, 256], strides = [1, 1]} : vector<4x256xf32> to vector<1x256xf32>
    %10 = vector.broadcast %8 : vector<8x1xf32> to vector<8x256xf32>
    %11 = vector.broadcast %9 : vector<1x256xf32> to vector<8x256xf32>
    %12 = arith.mulf %10, %11 : vector<8x256xf32>
    %13 = arith.addf %7, %12 : vector<8x256xf32>
    %14 = vector.extract_strided_slice %2 {offsets = [0, 2], sizes = [8, 1], strides = [1, 1]} : vector<8x4xf32> to vector<8x1xf32>
    %15 = vector.extract_strided_slice %1 {offsets = [2, 0], sizes = [1, 256], strides = [1, 1]} : vector<4x256xf32> to vector<1x256xf32>
    %16 = vector.broadcast %14 : vector<8x1xf32> to vector<8x256xf32>
    %17 = vector.broadcast %15 : vector<1x256xf32> to vector<8x256xf32>
    %18 = arith.mulf %16, %17 : vector<8x256xf32>
    %19 = arith.addf %13, %18 : vector<8x256xf32>
    %20 = vector.extract_strided_slice %2 {offsets = [0, 3], sizes = [8, 1], strides = [1, 1]} : vector<8x4xf32> to vector<8x1xf32>
    %21 = vector.extract_strided_slice %1 {offsets = [3, 0], sizes = [1, 256], strides = [1, 1]} : vector<4x256xf32> to vector<1x256xf32>
    %22 = vector.broadcast %20 : vector<8x1xf32> to vector<8x256xf32>
    %23 = vector.broadcast %21 : vector<1x256xf32> to vector<8x256xf32>
    %24 = arith.mulf %22, %23 : vector<8x256xf32>
    %25 = arith.addf %19, %24 : vector<8x256xf32>
    %c0_4 = arith.constant 0 : index
    %c0_5 = arith.constant 0 : index
    %26 = vector.load %arg3[%c0_4, %c0_5] : memref<8x1xf32, #tpu.memory_space<vmem>>, vector<8x1xf32>
    %27 = vector.broadcast %26 : vector<8x1xf32> to vector<8x256xf32>
    %28 = arith.addf %25, %27 : vector<8x256xf32>
    %cst = arith.constant 0.000000e+00 : f32
    %29 = vector.broadcast %cst : f32 to vector<8x256xf32>
    %30 = arith.cmpf ogt, %28, %29 : vector<8x256xf32>
    %cst_6 = arith.constant 3.000000e-01 : f32
    %31 = vector.broadcast %cst_6 : f32 to vector<8x256xf32>
    %32 = arith.mulf %31, %28 : vector<8x256xf32>
    %33 = arith.select %30, %28, %32 : vector<8x256xi1>, vector<8x256xf32>
    %c0_7 = arith.constant 0 : index
    %c0_8 = arith.constant 0 : index
    %34 = vector.load %arg4[%c0_7, %c0_8] : memref<16x8xf32, #tpu.memory_space<vmem>>, vector<16x8xf32>
    %35 = vector.extract_strided_slice %34 {offsets = [0, 0], sizes = [16, 1], strides = [1, 1]} : vector<16x8xf32> to vector<16x1xf32>
    %36 = vector.extract_strided_slice %33 {offsets = [0, 0], sizes = [1, 256], strides = [1, 1]} : vector<8x256xf32> to vector<1x256xf32>
    %37 = vector.broadcast %35 : vector<16x1xf32> to vector<16x256xf32>
    %38 = vector.broadcast %36 : vector<1x256xf32> to vector<16x256xf32>
    %39 = arith.mulf %37, %38 : vector<16x256xf32>
    %40 = vector.extract_strided_slice %34 {offsets = [0, 1], sizes = [16, 1], strides = [1, 1]} : vector<16x8xf32> to vector<16x1xf32>
    %41 = vector.extract_strided_slice %33 {offsets = [1, 0], sizes = [1, 256], strides = [1, 1]} : vector<8x256xf32> to vector<1x256xf32>
    %42 = vector.broadcast %40 : vector<16x1xf32> to vector<16x256xf32>
    %43 = vector.broadcast %41 : vector<1x256xf32> to vector<16x256xf32>
    %44 = arith.mulf %42, %43 : vector<16x256xf32>
    %45 = arith.addf %39, %44 : vector<16x256xf32>
    %46 = vector.extract_strided_slice %34 {offsets = [0, 2], sizes = [16, 1], strides = [1, 1]} : vector<16x8xf32> to vector<16x1xf32>
    %47 = vector.extract_strided_slice %33 {offsets = [2, 0], sizes = [1, 256], strides = [1, 1]} : vector<8x256xf32> to vector<1x256xf32>
    %48 = vector.broadcast %46 : vector<16x1xf32> to vector<16x256xf32>
    %49 = vector.broadcast %47 : vector<1x256xf32> to vector<16x256xf32>
    %50 = arith.mulf %48, %49 : vector<16x256xf32>
    %51 = arith.addf %45, %50 : vector<16x256xf32>
    %52 = vector.extract_strided_slice %34 {offsets = [0, 3], sizes = [16, 1], strides = [1, 1]} : vector<16x8xf32> to vector<16x1xf32>
    %53 = vector.extract_strided_slice %33 {offsets = [3, 0], sizes = [1, 256], strides = [1, 1]} : vector<8x256xf32> to vector<1x256xf32>
    %54 = vector.broadcast %52 : vector<16x1xf32> to vector<16x256xf32>
    %55 = vector.broadcast %53 : vector<1x256xf32> to vector<16x256xf32>
    %56 = arith.mulf %54, %55 : vector<16x256xf32>
    %57 = arith.addf %51, %56 : vector<16x256xf32>
    %58 = vector.extract_strided_slice %34 {offsets = [0, 4], sizes = [16, 1], strides = [1, 1]} : vector<16x8xf32> to vector<16x1xf32>
    %59 = vector.extract_strided_slice %33 {offsets = [4, 0], sizes = [1, 256], strides = [1, 1]} : vector<8x256xf32> to vector<1x256xf32>
    %60 = vector.broadcast %58 : vector<16x1xf32> to vector<16x256xf32>
    %61 = vector.broadcast %59 : vector<1x256xf32> to vector<16x256xf32>
    %62 = arith.mulf %60, %61 : vector<16x256xf32>
    %63 = arith.addf %57, %62 : vector<16x256xf32>
    %64 = vector.extract_strided_slice %34 {offsets = [0, 5], sizes = [16, 1], strides = [1, 1]} : vector<16x8xf32> to vector<16x1xf32>
    %65 = vector.extract_strided_slice %33 {offsets = [5, 0], sizes = [1, 256], strides = [1, 1]} : vector<8x256xf32> to vector<1x256xf32>
    %66 = vector.broadcast %64 : vector<16x1xf32> to vector<16x256xf32>
    %67 = vector.broadcast %65 : vector<1x256xf32> to vector<16x256xf32>
    %68 = arith.mulf %66, %67 : vector<16x256xf32>
    %69 = arith.addf %63, %68 : vector<16x256xf32>
    %70 = vector.extract_strided_slice %34 {offsets = [0, 6], sizes = [16, 1], strides = [1, 1]} : vector<16x8xf32> to vector<16x1xf32>
    %71 = vector.extract_strided_slice %33 {offsets = [6, 0], sizes = [1, 256], strides = [1, 1]} : vector<8x256xf32> to vector<1x256xf32>
    %72 = vector.broadcast %70 : vector<16x1xf32> to vector<16x256xf32>
    %73 = vector.broadcast %71 : vector<1x256xf32> to vector<16x256xf32>
    %74 = arith.mulf %72, %73 : vector<16x256xf32>
    %75 = arith.addf %69, %74 : vector<16x256xf32>
    %76 = vector.extract_strided_slice %34 {offsets = [0, 7], sizes = [16, 1], strides = [1, 1]} : vector<16x8xf32> to vector<16x1xf32>
    %77 = vector.extract_strided_slice %33 {offsets = [7, 0], sizes = [1, 256], strides = [1, 1]} : vector<8x256xf32> to vector<1x256xf32>
    %78 = vector.broadcast %76 : vector<16x1xf32> to vector<16x256xf32>
    %79 = vector.broadcast %77 : vector<1x256xf32> to vector<16x256xf32>
    %80 = arith.mulf %78, %79 : vector<16x256xf32>
    %81 = arith.addf %75, %80 : vector<16x256xf32>
    %c0_9 = arith.constant 0 : index
    %c0_10 = arith.constant 0 : index
    %82 = vector.load %arg5[%c0_9, %c0_10] : memref<16x1xf32, #tpu.memory_space<vmem>>, vector<16x1xf32>
    %83 = vector.broadcast %82 : vector<16x1xf32> to vector<16x256xf32>
    %84 = arith.addf %81, %83 : vector<16x256xf32>
    %cst_11 = arith.constant 0.000000e+00 : f32
    %85 = vector.broadcast %cst_11 : f32 to vector<16x256xf32>
    %86 = arith.cmpf ogt, %84, %85 : vector<16x256xf32>
    %cst_12 = arith.constant 3.000000e-01 : f32
    %87 = vector.broadcast %cst_12 : f32 to vector<16x256xf32>
    %88 = arith.mulf %87, %84 : vector<16x256xf32>
    %89 = arith.select %86, %84, %88 : vector<16x256xi1>, vector<16x256xf32>
    %cst_13 = arith.constant 0.000000e+00 : f32
    %90 = vector.broadcast %cst_13 : f32 to vector<16x512xf32>
    %c0_14 = arith.constant 0 : index
    %c0_15 = arith.constant 0 : index
    %91 = vector.load %arg11[%c0_14, %c0_15] : memref<16x512xf32, #tpu.memory_space<vmem>>, vector<16x512xf32>
    tpu.vector_store %arg11[%c0_14, %c0_15], %90 {strides = array<i32>} : memref<16x512xf32, #tpu.memory_space<vmem>>, vector<16x512xf32>,
    %c0_16 = arith.constant 0 : index
    %c128 = arith.constant 128 : index
    %92 = vector.load %arg11[%c0_16, %c128] : memref<16x512xf32, #tpu.memory_space<vmem>>, vector<16x256xf32>
    tpu.vector_store %arg11[%c0_16, %c128], %89 {strides = array<i32>} : memref<16x512xf32, #tpu.memory_space<vmem>>, vector<16x256xf32>,
    %93 = tpu.iota {dimensions = array<i32: 1>} : vector<1x256xi32>
    %c16_i32 = arith.constant 16 : i32
    %c0_i32 = arith.constant 0 : i32
    %94 = arith.cmpi eq, %c16_i32, %c0_i32 : i32
    %c1_i32 = arith.constant 1 : i32
    %95 = arith.select %94, %c1_i32, %c16_i32 : i32
    %96 = vector.broadcast %95 : i32 to vector<1x256xi32>
    %97 = arith.remsi %93, %96 : vector<1x256xi32>
    %c0_i32_17 = arith.constant 0 : i32
    %98 = vector.broadcast %c0_i32_17 : i32 to vector<1x256xi32>
    %99 = arith.cmpi ne, %97, %98 : vector<1x256xi32>
    %c0_i32_18 = arith.constant 0 : i32
    %100 = vector.broadcast %c0_i32_18 : i32 to vector<1x256xi32>
    %101 = arith.cmpi slt, %97, %100 : vector<1x256xi32>
    %c0_i32_19 = arith.constant 0 : i32
    %102 = arith.cmpi slt, %95, %c0_i32_19 : i32
    %103 = vector.broadcast %102 : i1 to vector<1x256xi1>
    %104 = vector.broadcast %103 : vector<1x256xi1> to vector<1x256xi1>
    %105 = arith.xori %101, %104 : vector<1x256xi1>
    %106 = arith.andi %105, %99 : vector<1x256xi1>
    %107 = vector.broadcast %95 : i32 to vector<1x256xi32>
    %108 = arith.addi %97, %107 : vector<1x256xi32>
    %109 = arith.select %106, %108, %97 : vector<1x256xi1>, vector<1x256xi32>
    %c1_i32_20 = arith.constant 1 : i32
    %110 = vector.broadcast %c1_i32_20 : i32 to vector<1x256xi32>
    %111 = arith.cmpi sge, %109, %110 : vector<1x256xi32>
    %c14_i32 = arith.constant 14 : i32
    %112 = vector.broadcast %c14_i32 : i32 to vector<1x256xi32>
    %113 = arith.cmpi sle, %109, %112 : vector<1x256xi32>
    %c0_21 = arith.constant 0 : index
    %c111 = arith.constant 111 : index
    %114 = vector.load %arg11[%c0_21, %c111] : memref<16x512xf32, #tpu.memory_space<vmem>>, vector<16x256xf32>
    %cst_22 = arith.constant 0.000000e+00 : f32
    %115 = vector.shape_cast %111 : vector<1x256xi1> to vector<1x256xi1>
    %116 = vector.broadcast %115 : vector<1x256xi1> to vector<16x256xi1>
    %117 = vector.broadcast %cst_22 : f32 to vector<16x256xf32>
    %118 = arith.select %116, %114, %117 : vector<16x256xi1>, vector<16x256xf32>
    %c0_23 = arith.constant 0 : index
    %c0_24 = arith.constant 0 : index
    %c0_25 = arith.constant 0 : index
    %119 = vector.load %arg6[%c0_23, %c0_24, %c0_25] : memref<9x16x16xf32, #tpu.memory_space<vmem>>, vector<1x16x16xf32>
    %120 = vector.shape_cast %119 : vector<1x16x16xf32> to vector<16x16xf32>
    %cst_26 = arith.constant dense<0.000000e+00> : vector<16x256xf32>
    %121 = tpu.matmul %120, %118, %cst_26 {dimension_numbers = #tpu.dot_dimension_numbers<[1], [0], [0], [1], [0, 0, 1, 1], [], []>} : vector<16x16xf32>, vector<16x256xf32>, vector<16x256xf32> -> vector<16x256xf32>
    %c0_27 = arith.constant 0 : index
    %c112 = arith.constant 112 : index
    %122 = vector.load %arg11[%c0_27, %c112] : memref<16x512xf32, #tpu.memory_space<vmem>>, vector<16x256xf32>
    %c1 = arith.constant 1 : index
    %c0_28 = arith.constant 0 : index
    %c0_29 = arith.constant 0 : index
    %123 = vector.load %arg6[%c1, %c0_28, %c0_29] : memref<9x16x16xf32, #tpu.memory_space<vmem>>, vector<1x16x16xf32>
    %124 = vector.shape_cast %123 : vector<1x16x16xf32> to vector<16x16xf32>
    %cst_30 = arith.constant dense<0.000000e+00> : vector<16x256xf32>
    %125 = tpu.matmul %124, %122, %cst_30 {dimension_numbers = #tpu.dot_dimension_numbers<[1], [0], [0], [1], [0, 0, 1, 1], [], []>} : vector<16x16xf32>, vector<16x256xf32>, vector<16x256xf32> -> vector<16x256xf32>
    %126 = arith.addf %121, %125 : vector<16x256xf32>
    %c0_31 = arith.constant 0 : index
    %c113 = arith.constant 113 : index
    %127 = vector.load %arg11[%c0_31, %c113] : memref<16x512xf32, #tpu.memory_space<vmem>>, vector<16x256xf32>
    %cst_32 = arith.constant 0.000000e+00 : f32
    %128 = vector.shape_cast %113 : vector<1x256xi1> to vector<1x256xi1>
    %129 = vector.broadcast %128 : vector<1x256xi1> to vector<16x256xi1>
    %130 = vector.broadcast %cst_32 : f32 to vector<16x256xf32>
    %131 = arith.select %129, %127, %130 : vector<16x256xi1>, vector<16x256xf32>
    %c2 = arith.constant 2 : index
    %c0_33 = arith.constant 0 : index
    %c0_34 = arith.constant 0 : index
    %132 = vector.load %arg6[%c2, %c0_33, %c0_34] : memref<9x16x16xf32, #tpu.memory_space<vmem>>, vector<1x16x16xf32>
    %133 = vector.shape_cast %132 : vector<1x16x16xf32> to vector<16x16xf32>
    %cst_35 = arith.constant dense<0.000000e+00> : vector<16x256xf32>
    %134 = tpu.matmul %133, %131, %cst_35 {dimension_numbers = #tpu.dot_dimension_numbers<[1], [0], [0], [1], [0, 0, 1, 1], [], []>} : vector<16x16xf32>, vector<16x256xf32>, vector<16x256xf32> -> vector<16x256xf32>
    %135 = arith.addf %126, %134 : vector<16x256xf32>
    %c0_36 = arith.constant 0 : index
    %c127 = arith.constant 127 : index
    %136 = vector.load %arg11[%c0_36, %c127] : memref<16x512xf32, #tpu.memory_space<vmem>>, vector<16x256xf32>
    %cst_37 = arith.constant 0.000000e+00 : f32
    %137 = vector.shape_cast %111 : vector<1x256xi1> to vector<1x256xi1>
    %138 = vector.broadcast %137 : vector<1x256xi1> to vector<16x256xi1>
    %139 = vector.broadcast %cst_37 : f32 to vector<16x256xf32>
    %140 = arith.select %138, %136, %139 : vector<16x256xi1>, vector<16x256xf32>
    %c3 = arith.constant 3 : index
    %c0_38 = arith.constant 0 : index
    %c0_39 = arith.constant 0 : index
    %141 = vector.load %arg6[%c3, %c0_38, %c0_39] : memref<9x16x16xf32, #tpu.memory_space<vmem>>, vector<1x16x16xf32>
    %142 = vector.shape_cast %141 : vector<1x16x16xf32> to vector<16x16xf32>
    %cst_40 = arith.constant dense<0.000000e+00> : vector<16x256xf32>
    %143 = tpu.matmul %142, %140, %cst_40 {dimension_numbers = #tpu.dot_dimension_numbers<[1], [0], [0], [1], [0, 0, 1, 1], [], []>} : vector<16x16xf32>, vector<16x256xf32>, vector<16x256xf32> -> vector<16x256xf32>
    %144 = arith.addf %135, %143 : vector<16x256xf32>
    %c0_41 = arith.constant 0 : index
    %c128_42 = arith.constant 128 : index
    %145 = vector.load %arg11[%c0_41, %c128_42] : memref<16x512xf32, #tpu.memory_space<vmem>>, vector<16x256xf32>
    %c4 = arith.constant 4 : index
    %c0_43 = arith.constant 0 : index
    %c0_44 = arith.constant 0 : index
    %146 = vector.load %arg6[%c4, %c0_43, %c0_44] : memref<9x16x16xf32, #tpu.memory_space<vmem>>, vector<1x16x16xf32>
    %147 = vector.shape_cast %146 : vector<1x16x16xf32> to vector<16x16xf32>
    %cst_45 = arith.constant dense<0.000000e+00> : vector<16x256xf32>
    %148 = tpu.matmul %147, %145, %cst_45 {dimension_numbers = #tpu.dot_dimension_numbers<[1], [0], [0], [1], [0, 0, 1, 1], [], []>} : vector<16x16xf32>, vector<16x256xf32>, vector<16x256xf32> -> vector<16x256xf32>
    %149 = arith.addf %144, %148 : vector<16x256xf32>
    %c0_46 = arith.constant 0 : index
    %c129 = arith.constant 129 : index
    %150 = vector.load %arg11[%c0_46, %c129] : memref<16x512xf32, #tpu.memory_space<vmem>>, vector<16x256xf32>
    %cst_47 = arith.constant 0.000000e+00 : f32
    %151 = vector.shape_cast %113 : vector<1x256xi1> to vector<1x256xi1>
    %152 = vector.broadcast %151 : vector<1x256xi1> to vector<16x256xi1>
    %153 = vector.broadcast %cst_47 : f32 to vector<16x256xf32>
    %154 = arith.select %152, %150, %153 : vector<16x256xi1>, vector<16x256xf32>
    %c5 = arith.constant 5 : index
    %c0_48 = arith.constant 0 : index
    %c0_49 = arith.constant 0 : index
    %155 = vector.load %arg6[%c5, %c0_48, %c0_49] : memref<9x16x16xf32, #tpu.memory_space<vmem>>, vector<1x16x16xf32>
    %156 = vector.shape_cast %155 : vector<1x16x16xf32> to vector<16x16xf32>
    %cst_50 = arith.constant dense<0.000000e+00> : vector<16x256xf32>
    %157 = tpu.matmul %156, %154, %cst_50 {dimension_numbers = #tpu.dot_dimension_numbers<[1], [0], [0], [1], [0, 0, 1, 1], [], []>} : vector<16x16xf32>, vector<16x256xf32>, vector<16x256xf32> -> vector<16x256xf32>
    %158 = arith.addf %149, %157 : vector<16x256xf32>
    %c0_51 = arith.constant 0 : index
    %c143 = arith.constant 143 : index
    %159 = vector.load %arg11[%c0_51, %c143] : memref<16x512xf32, #tpu.memory_space<vmem>>, vector<16x256xf32>
    %cst_52 = arith.constant 0.000000e+00 : f32
    %160 = vector.shape_cast %111 : vector<1x256xi1> to vector<1x256xi1>
    %161 = vector.broadcast %160 : vector<1x256xi1> to vector<16x256xi1>
    %162 = vector.broadcast %cst_52 : f32 to vector<16x256xf32>
    %163 = arith.select %161, %159, %162 : vector<16x256xi1>, vector<16x256xf32>
    %c6 = arith.constant 6 : index
    %c0_53 = arith.constant 0 : index
    %c0_54 = arith.constant 0 : index
    %164 = vector.load %arg6[%c6, %c0_53, %c0_54] : memref<9x16x16xf32, #tpu.memory_space<vmem>>, vector<1x16x16xf32>
    %165 = vector.shape_cast %164 : vector<1x16x16xf32> to vector<16x16xf32>
    %cst_55 = arith.constant dense<0.000000e+00> : vector<16x256xf32>
    %166 = tpu.matmul %165, %163, %cst_55 {dimension_numbers = #tpu.dot_dimension_numbers<[1], [0], [0], [1], [0, 0, 1, 1], [], []>} : vector<16x16xf32>, vector<16x256xf32>, vector<16x256xf32> -> vector<16x256xf32>
    %167 = arith.addf %158, %166 : vector<16x256xf32>
    %c0_56 = arith.constant 0 : index
    %c144 = arith.constant 144 : index
    %168 = vector.load %arg11[%c0_56, %c144] : memref<16x512xf32, #tpu.memory_space<vmem>>, vector<16x256xf32>
    %c7 = arith.constant 7 : index
    %c0_57 = arith.constant 0 : index
    %c0_58 = arith.constant 0 : index
    %169 = vector.load %arg6[%c7, %c0_57, %c0_58] : memref<9x16x16xf32, #tpu.memory_space<vmem>>, vector<1x16x16xf32>
    %170 = vector.shape_cast %169 : vector<1x16x16xf32> to vector<16x16xf32>
    %cst_59 = arith.constant dense<0.000000e+00> : vector<16x256xf32>
    %171 = tpu.matmul %170, %168, %cst_59 {dimension_numbers = #tpu.dot_dimension_numbers<[1], [0], [0], [1], [0, 0, 1, 1], [], []>} : vector<16x16xf32>, vector<16x256xf32>, vector<16x256xf32> -> vector<16x256xf32>
    %172 = arith.addf %167, %171 : vector<16x256xf32>
    %c0_60 = arith.constant 0 : index
    %c145 = arith.constant 145 : index
    %173 = vector.load %arg11[%c0_60, %c145] : memref<16x512xf32, #tpu.memory_space<vmem>>, vector<16x256xf32>
    %cst_61 = arith.constant 0.000000e+00 : f32
    %174 = vector.shape_cast %113 : vector<1x256xi1> to vector<1x256xi1>
    %175 = vector.broadcast %174 : vector<1x256xi1> to vector<16x256xi1>
    %176 = vector.broadcast %cst_61 : f32 to vector<16x256xf32>
    %177 = arith.select %175, %173, %176 : vector<16x256xi1>, vector<16x256xf32>
    %c8 = arith.constant 8 : index
    %c0_62 = arith.constant 0 : index
    %c0_63 = arith.constant 0 : index
    %178 = vector.load %arg6[%c8, %c0_62, %c0_63] : memref<9x16x16xf32, #tpu.memory_space<vmem>>, vector<1x16x16xf32>
    %179 = vector.shape_cast %178 : vector<1x16x16xf32> to vector<16x16xf32>
    %cst_64 = arith.constant dense<0.000000e+00> : vector<16x256xf32>
    %180 = tpu.matmul %179, %177, %cst_64 {dimension_numbers = #tpu.dot_dimension_numbers<[1], [0], [0], [1], [0, 0, 1, 1], [], []>} : vector<16x16xf32>, vector<16x256xf32>, vector<16x256xf32> -> vector<16x256xf32>
    %181 = arith.addf %172, %180 : vector<16x256xf32>
    %c0_65 = arith.constant 0 : index
    %c0_66 = arith.constant 0 : index
    %182 = vector.load %arg7[%c0_65, %c0_66] : memref<16x1xf32, #tpu.memory_space<vmem>>, vector<16x1xf32>
    %183 = vector.broadcast %182 : vector<16x1xf32> to vector<16x256xf32>
    %184 = arith.addf %181, %183 : vector<16x256xf32>
    %cst_67 = arith.constant 0.000000e+00 : f32
    %185 = vector.broadcast %cst_67 : f32 to vector<16x256xf32>
    %186 = arith.cmpf ogt, %184, %185 : vector<16x256xf32>
    %cst_68 = arith.constant 3.000000e-01 : f32
    %187 = vector.broadcast %cst_68 : f32 to vector<16x256xf32>
    %188 = arith.mulf %187, %184 : vector<16x256xf32>
    %189 = arith.select %186, %184, %188 : vector<16x256xi1>, vector<16x256xf32>
    %c0_69 = arith.constant 0 : index
    %c0_70 = arith.constant 0 : index
    %190 = vector.load %arg8[%c0_69, %c0_70] : memref<4x16xf32, #tpu.memory_space<vmem>>, vector<4x16xf32>
    %191 = vector.extract_strided_slice %190 {offsets = [0, 0], sizes = [4, 1], strides = [1, 1]} : vector<4x16xf32> to vector<4x1xf32>
    %192 = vector.extract_strided_slice %189 {offsets = [0, 0], sizes = [1, 256], strides = [1, 1]} : vector<16x256xf32> to vector<1x256xf32>
    %193 = vector.broadcast %191 : vector<4x1xf32> to vector<4x256xf32>
    %194 = vector.broadcast %192 : vector<1x256xf32> to vector<4x256xf32>
    %195 = arith.mulf %193, %194 : vector<4x256xf32>
    %196 = vector.extract_strided_slice %190 {offsets = [0, 1], sizes = [4, 1], strides = [1, 1]} : vector<4x16xf32> to vector<4x1xf32>
    %197 = vector.extract_strided_slice %189 {offsets = [1, 0], sizes = [1, 256], strides = [1, 1]} : vector<16x256xf32> to vector<1x256xf32>
    %198 = vector.broadcast %196 : vector<4x1xf32> to vector<4x256xf32>
    %199 = vector.broadcast %197 : vector<1x256xf32> to vector<4x256xf32>
    %200 = arith.mulf %198, %199 : vector<4x256xf32>
    %201 = arith.addf %195, %200 : vector<4x256xf32>
    %202 = vector.extract_strided_slice %190 {offsets = [0, 2], sizes = [4, 1], strides = [1, 1]} : vector<4x16xf32> to vector<4x1xf32>
    %203 = vector.extract_strided_slice %189 {offsets = [2, 0], sizes = [1, 256], strides = [1, 1]} : vector<16x256xf32> to vector<1x256xf32>
    %204 = vector.broadcast %202 : vector<4x1xf32> to vector<4x256xf32>
    %205 = vector.broadcast %203 : vector<1x256xf32> to vector<4x256xf32>
    %206 = arith.mulf %204, %205 : vector<4x256xf32>
    %207 = arith.addf %201, %206 : vector<4x256xf32>
    %208 = vector.extract_strided_slice %190 {offsets = [0, 3], sizes = [4, 1], strides = [1, 1]} : vector<4x16xf32> to vector<4x1xf32>
    %209 = vector.extract_strided_slice %189 {offsets = [3, 0], sizes = [1, 256], strides = [1, 1]} : vector<16x256xf32> to vector<1x256xf32>
    %210 = vector.broadcast %208 : vector<4x1xf32> to vector<4x256xf32>
    %211 = vector.broadcast %209 : vector<1x256xf32> to vector<4x256xf32>
    %212 = arith.mulf %210, %211 : vector<4x256xf32>
    %213 = arith.addf %207, %212 : vector<4x256xf32>
    %214 = vector.extract_strided_slice %190 {offsets = [0, 4], sizes = [4, 1], strides = [1, 1]} : vector<4x16xf32> to vector<4x1xf32>
    %215 = vector.extract_strided_slice %189 {offsets = [4, 0], sizes = [1, 256], strides = [1, 1]} : vector<16x256xf32> to vector<1x256xf32>
    %216 = vector.broadcast %214 : vector<4x1xf32> to vector<4x256xf32>
    %217 = vector.broadcast %215 : vector<1x256xf32> to vector<4x256xf32>
    %218 = arith.mulf %216, %217 : vector<4x256xf32>
    %219 = arith.addf %213, %218 : vector<4x256xf32>
    %220 = vector.extract_strided_slice %190 {offsets = [0, 5], sizes = [4, 1], strides = [1, 1]} : vector<4x16xf32> to vector<4x1xf32>
    %221 = vector.extract_strided_slice %189 {offsets = [5, 0], sizes = [1, 256], strides = [1, 1]} : vector<16x256xf32> to vector<1x256xf32>
    %222 = vector.broadcast %220 : vector<4x1xf32> to vector<4x256xf32>
    %223 = vector.broadcast %221 : vector<1x256xf32> to vector<4x256xf32>
    %224 = arith.mulf %222, %223 : vector<4x256xf32>
    %225 = arith.addf %219, %224 : vector<4x256xf32>
    %226 = vector.extract_strided_slice %190 {offsets = [0, 6], sizes = [4, 1], strides = [1, 1]} : vector<4x16xf32> to vector<4x1xf32>
    %227 = vector.extract_strided_slice %189 {offsets = [6, 0], sizes = [1, 256], strides = [1, 1]} : vector<16x256xf32> to vector<1x256xf32>
    %228 = vector.broadcast %226 : vector<4x1xf32> to vector<4x256xf32>
    %229 = vector.broadcast %227 : vector<1x256xf32> to vector<4x256xf32>
    %230 = arith.mulf %228, %229 : vector<4x256xf32>
    %231 = arith.addf %225, %230 : vector<4x256xf32>
    %232 = vector.extract_strided_slice %190 {offsets = [0, 7], sizes = [4, 1], strides = [1, 1]} : vector<4x16xf32> to vector<4x1xf32>
    %233 = vector.extract_strided_slice %189 {offsets = [7, 0], sizes = [1, 256], strides = [1, 1]} : vector<16x256xf32> to vector<1x256xf32>
    %234 = vector.broadcast %232 : vector<4x1xf32> to vector<4x256xf32>
    %235 = vector.broadcast %233 : vector<1x256xf32> to vector<4x256xf32>
    %236 = arith.mulf %234, %235 : vector<4x256xf32>
    %237 = arith.addf %231, %236 : vector<4x256xf32>
    %238 = vector.extract_strided_slice %190 {offsets = [0, 8], sizes = [4, 1], strides = [1, 1]} : vector<4x16xf32> to vector<4x1xf32>
    %239 = vector.extract_strided_slice %189 {offsets = [8, 0], sizes = [1, 256], strides = [1, 1]} : vector<16x256xf32> to vector<1x256xf32>
    %240 = vector.broadcast %238 : vector<4x1xf32> to vector<4x256xf32>
    %241 = vector.broadcast %239 : vector<1x256xf32> to vector<4x256xf32>
    %242 = arith.mulf %240, %241 : vector<4x256xf32>
    %243 = arith.addf %237, %242 : vector<4x256xf32>
    %244 = vector.extract_strided_slice %190 {offsets = [0, 9], sizes = [4, 1], strides = [1, 1]} : vector<4x16xf32> to vector<4x1xf32>
    %245 = vector.extract_strided_slice %189 {offsets = [9, 0], sizes = [1, 256], strides = [1, 1]} : vector<16x256xf32> to vector<1x256xf32>
    %246 = vector.broadcast %244 : vector<4x1xf32> to vector<4x256xf32>
    %247 = vector.broadcast %245 : vector<1x256xf32> to vector<4x256xf32>
    %248 = arith.mulf %246, %247 : vector<4x256xf32>
    %249 = arith.addf %243, %248 : vector<4x256xf32>
    %250 = vector.extract_strided_slice %190 {offsets = [0, 10], sizes = [4, 1], strides = [1, 1]} : vector<4x16xf32> to vector<4x1xf32>
    %251 = vector.extract_strided_slice %189 {offsets = [10, 0], sizes = [1, 256], strides = [1, 1]} : vector<16x256xf32> to vector<1x256xf32>
    %252 = vector.broadcast %250 : vector<4x1xf32> to vector<4x256xf32>
    %253 = vector.broadcast %251 : vector<1x256xf32> to vector<4x256xf32>
    %254 = arith.mulf %252, %253 : vector<4x256xf32>
    %255 = arith.addf %249, %254 : vector<4x256xf32>
    %256 = vector.extract_strided_slice %190 {offsets = [0, 11], sizes = [4, 1], strides = [1, 1]} : vector<4x16xf32> to vector<4x1xf32>
    %257 = vector.extract_strided_slice %189 {offsets = [11, 0], sizes = [1, 256], strides = [1, 1]} : vector<16x256xf32> to vector<1x256xf32>
    %258 = vector.broadcast %256 : vector<4x1xf32> to vector<4x256xf32>
    %259 = vector.broadcast %257 : vector<1x256xf32> to vector<4x256xf32>
    %260 = arith.mulf %258, %259 : vector<4x256xf32>
    %261 = arith.addf %255, %260 : vector<4x256xf32>
    %262 = vector.extract_strided_slice %190 {offsets = [0, 12], sizes = [4, 1], strides = [1, 1]} : vector<4x16xf32> to vector<4x1xf32>
    %263 = vector.extract_strided_slice %189 {offsets = [12, 0], sizes = [1, 256], strides = [1, 1]} : vector<16x256xf32> to vector<1x256xf32>
    %264 = vector.broadcast %262 : vector<4x1xf32> to vector<4x256xf32>
    %265 = vector.broadcast %263 : vector<1x256xf32> to vector<4x256xf32>
    %266 = arith.mulf %264, %265 : vector<4x256xf32>
    %267 = arith.addf %261, %266 : vector<4x256xf32>
    %268 = vector.extract_strided_slice %190 {offsets = [0, 13], sizes = [4, 1], strides = [1, 1]} : vector<4x16xf32> to vector<4x1xf32>
    %269 = vector.extract_strided_slice %189 {offsets = [13, 0], sizes = [1, 256], strides = [1, 1]} : vector<16x256xf32> to vector<1x256xf32>
    %270 = vector.broadcast %268 : vector<4x1xf32> to vector<4x256xf32>
    %271 = vector.broadcast %269 : vector<1x256xf32> to vector<4x256xf32>
    %272 = arith.mulf %270, %271 : vector<4x256xf32>
    %273 = arith.addf %267, %272 : vector<4x256xf32>
    %274 = vector.extract_strided_slice %190 {offsets = [0, 14], sizes = [4, 1], strides = [1, 1]} : vector<4x16xf32> to vector<4x1xf32>
    %275 = vector.extract_strided_slice %189 {offsets = [14, 0], sizes = [1, 256], strides = [1, 1]} : vector<16x256xf32> to vector<1x256xf32>
    %276 = vector.broadcast %274 : vector<4x1xf32> to vector<4x256xf32>
    %277 = vector.broadcast %275 : vector<1x256xf32> to vector<4x256xf32>
    %278 = arith.mulf %276, %277 : vector<4x256xf32>
    %279 = arith.addf %273, %278 : vector<4x256xf32>
    %280 = vector.extract_strided_slice %190 {offsets = [0, 15], sizes = [4, 1], strides = [1, 1]} : vector<4x16xf32> to vector<4x1xf32>
    %281 = vector.extract_strided_slice %189 {offsets = [15, 0], sizes = [1, 256], strides = [1, 1]} : vector<16x256xf32> to vector<1x256xf32>
    %282 = vector.broadcast %280 : vector<4x1xf32> to vector<4x256xf32>
    %283 = vector.broadcast %281 : vector<1x256xf32> to vector<4x256xf32>
    %284 = arith.mulf %282, %283 : vector<4x256xf32>
    %285 = arith.addf %279, %284 : vector<4x256xf32>
    %c0_71 = arith.constant 0 : index
    %c0_72 = arith.constant 0 : index
    %286 = vector.load %arg9[%c0_71, %c0_72] : memref<4x1xf32, #tpu.memory_space<vmem>>, vector<4x1xf32>
    %287 = vector.broadcast %286 : vector<4x1xf32> to vector<4x256xf32>
    %288 = arith.addf %285, %287 : vector<4x256xf32>
    %cst_73 = arith.constant 0.000000e+00 : f32
    %289 = vector.broadcast %cst_73 : f32 to vector<4x256xf32>
    %290 = arith.cmpf ogt, %288, %289 : vector<4x256xf32>
    %cst_74 = arith.constant 3.000000e-01 : f32
    %291 = vector.broadcast %cst_74 : f32 to vector<4x256xf32>
    %292 = arith.mulf %291, %288 : vector<4x256xf32>
    %293 = arith.select %290, %288, %292 : vector<4x256xi1>, vector<4x256xf32>
    %294 = arith.addf %293, %1 : vector<4x256xf32>
    %c0_75 = arith.constant 0 : index
    %c0_76 = arith.constant 0 : index
    %c0_77 = arith.constant 0 : index
    %295 = vector.load %arg10[%c0_75, %c0_76, %c0_77] : memref<1x4x256xf32, #tpu.memory_space<vmem>>, vector<1x4x256xf32>
    %296 = vector.shape_cast %295 : vector<1x4x256xf32> to vector<4x256xf32>
    %297 = vector.shape_cast %294 : vector<4x256xf32> to vector<1x4x256xf32>
    tpu.vector_store %arg10[%c0_75, %c0_76, %c0_77], %297 {strides = array<i32>} : memref<1x4x256xf32, #tpu.memory_space<vmem>>, vector<1x4x256xf32>,
    return
  }
  func.func @transform_0(%arg0: i32) -> (i32, i32, i32) {
    %c0_i32 = arith.constant 0 : i32
    %c0_i32_0 = arith.constant 0 : i32
    %c0_i32_1 = arith.constant 0 : i32
    return %arg0, %c0_i32, %c0_i32_0 : i32, i32, i32
  }
  func.func @transform_1(%arg0: i32) -> (i32, i32) {
    %c0_i32 = arith.constant 0 : i32
    %c0_i32_0 = arith.constant 0 : i32
    %c0_i32_1 = arith.constant 0 : i32
    return %c0_i32, %c0_i32_0 : i32, i32
  }
  func.func @transform_2(%arg0: i32) -> (i32, i32) {
    %c0_i32 = arith.constant 0 : i32
    %c0_i32_0 = arith.constant 0 : i32
    %c0_i32_1 = arith.constant 0 : i32
    return %c0_i32, %c0_i32_0 : i32, i32
  }
  func.func @transform_3(%arg0: i32) -> (i32, i32) {
    %c0_i32 = arith.constant 0 : i32
    %c0_i32_0 = arith.constant 0 : i32
    %c0_i32_1 = arith.constant 0 : i32
    return %c0_i32, %c0_i32_0 : i32, i32
  }
  func.func @transform_4(%arg0: i32) -> (i32, i32) {
    %c0_i32 = arith.constant 0 : i32
    %c0_i32_0 = arith.constant 0 : i32
    %c0_i32_1 = arith.constant 0 : i32
    return %c0_i32, %c0_i32_0 : i32, i32
  }
  func.func @transform_5(%arg0: i32) -> (i32, i32, i32) {
    %c0_i32 = arith.constant 0 : i32
    %c0_i32_0 = arith.constant 0 : i32
    %c0_i32_1 = arith.constant 0 : i32
    %c0_i32_2 = arith.constant 0 : i32
    return %c0_i32, %c0_i32_0, %c0_i32_1 : i32, i32, i32
  }
  func.func @transform_6(%arg0: i32) -> (i32, i32) {
    %c0_i32 = arith.constant 0 : i32
    %c0_i32_0 = arith.constant 0 : i32
    %c0_i32_1 = arith.constant 0 : i32
    return %c0_i32, %c0_i32_0 : i32, i32
  }
  func.func @transform_7(%arg0: i32) -> (i32, i32) {
    %c0_i32 = arith.constant 0 : i32
    %c0_i32_0 = arith.constant 0 : i32
    %c0_i32_1 = arith.constant 0 : i32
    return %c0_i32, %c0_i32_0 : i32, i32
  }
  func.func @transform_8(%arg0: i32) -> (i32, i32) {
    %c0_i32 = arith.constant 0 : i32
    %c0_i32_0 = arith.constant 0 : i32
    %c0_i32_1 = arith.constant 0 : i32
    return %c0_i32, %c0_i32_0 : i32, i32
  }
  func.func @transform_9(%arg0: i32) -> (i32, i32, i32) {
    %c0_i32 = arith.constant 0 : i32
    %c0_i32_0 = arith.constant 0 : i32
    %c0_i32_1 = arith.constant 0 : i32
    return %arg0, %c0_i32, %c0_i32_0 : i32, i32, i32
  }
}

</mosaic_0001>

<bundles_post_ra>
// kernel: _lambda_.1
= control target key start
LH: loop header
LB: loop body
LE: loop exit
PB: predicated region body
PF: predicated region fallthrough
CT: control target
= control target key end

     0   :  { %s2529_s30 = smov 0   ;;  %s2958_s0 = inlined_call_operand.vmem [shape: f32[2,4,256], index: 0, kind: input, shape index: {}]   ;;  %s2959_s1 = inlined_call_operand.vmem [shape: f32[8,4], index: 1, kind: input, shape index: {}]   ;;  %s2960_s2 = inlined_call_operand.vmem [shape: f32[8,1], index: 2, kind: input, shape index: {}]   ;;  %s2961_s3 = inlined_call_operand.vmem [shape: f32[16,8], index: 3, kind: input, shape index: {}]   ;;  %s2962_s4 = inlined_call_operand.vmem [shape: f32[16,1], index: 4, kind: input, shape index: {}]   ;;  %s2963_s5 = inlined_call_operand.vmem [shape: f32[9,16,16], index: 5, kind: input, shape index: {}]   ;;  %s2964_s6 = inlined_call_operand.vmem [shape: f32[16,1], index: 6, kind: input, shape index: {}]   ;;  %s2965_s7 = inlined_call_operand.vmem [shape: f32[4,16], index: 7, kind: input, shape index: {}]   ;;  %s2966_s8 = inlined_call_operand.vmem [shape: f32[4,1], index: 8, kind: input, shape index: {}]   ;;  %s2967_s9 = inlined_call_operand.vmem [shape: f32[2,4,256], index: 9, kind: output, shape index: {}]  }
   0x1 LB: > { %s2103_s10 = sadd.s32 4294967295, %s2452_s30   ;;  %p2107_p0 = scmp.ge.s32.totalorder %s2452_s30, 1  ;;  %s2452_s30 = sphi %s2529_s30, %s19_s30  }
   0x2   : > { %p287_p1 = scmp.lt.s32.totalorder %s2452_s30, 3 }
   0x4   : > { %p288_p2 = pnand %p2107_p0, %p287_p1 }
   0x5   : > { %v334_v0 = vld [vmem:[%s2959_s1] sm:$0xff] (!%p288_p2)  ;;  %v2454_v1 = vmov (!%p288_p2), 2   ;;  %v2455_v2 = vmov (!%p288_p2), 0   ;;  %v2456_v4 = vmov (!%p288_p2), 3   ;;  %v2457_v6 = vmov (!%p288_p2), 1   ;;  %v454_v7 = vld [vmem:[%s2961_s3 + $0x8] sm:$0xff] (!%p288_p2) }
   0x6   : > { %291 = sbr.rel (%p288_p2) target bundleno = 639 (0x27f), region = 56  ;;  %2290 = vset.pattern.permute.xlu1 (!%p288_p2), %v2454_v1  ;;  %2289 = vset.pattern.permute.xlu0 (!%p288_p2), %v2455_v2  ;;  %v453_v3 = vld [vmem:[%s2961_s3] sm:$0xff] (!%p288_p2)  ;;  %v2458_v8 = vmov (!%p288_p2), 4   ;;  %v2459_v9 = vmov (!%p288_p2), 6   ;;  %v2460_v10 = vmov (!%p288_p2), 7   ;;  %v2461_v11 = vmov (!%p288_p2), 5  }
   0x7   : > { %388 = vperm.xlu1 (!%p288_p2), %2290, %v334_v0   ;;  %337 = vperm.xlu0 (!%p288_p2), %2289, %v334_v0   ;;  %v439_v5 = vld [vmem:[%s2960_s2] sm:$0xff] (!%p288_p2)  ;;  %v2462_v12 = vmov (!%p288_p2), 0.0   ;;  %s2463_s21 = smov (!%p288_p2), 16   ;;  %v646_v14 = vld [vmem:[%s2962_s4 + $0x8] sm:$0xff] (!%p288_p2)  ;;  %s2464_s24 = smov (!%p288_p2), 17   ;;  %v341_v15 = vlaneseq (!%p288_p2)  ;;  %vm774_vm6 = vcmask (!%p288_p2), 130048  }
   0x8   : > { %1256 = vmatprep.mubr.f32.mxu0 (!%p288_p2), %v2462_v12  ;;  %853 = vmatprep.mubr.f32.mxu1 (!%p288_p2), %v2462_v12  ;;  %v645_v13 = vld [vmem:[%s2962_s4] sm:$0xff] (!%p288_p2)  ;;  %s2465_s25 = smov (!%p288_p2), 15   ;;  %p323_p3 = scmp.lt.s32.totalorder (!%p288_p2), %s2103_s10, 1  ;;  %vm1297_vm7 = vcmask (!%p288_p2), 1039360   ;;  %vm744_vm11 = vcmask (!%p288_p2), 138240  }
   0x9   : > { %v342_v16 = vshrl.u32 (!%p288_p2), %v341_v15, 7  ;;  %s2466_s11 = smov (!%p288_p2), 127   ;;  %s2467_s14 = smov (!%p288_p2), 113  }
   0xa   : > { %s2468_s15 = smov (!%p288_p2), 112   ;;  %s2469_s16 = smov (!%p288_p2), 1  }
   0xb   : > { %2291 = vset.pattern.permute.xlu1 (!%p288_p2), %v2456_v4  ;;  %457 = vperm.xlu0 (!%p288_p2), %2289, %v453_v3   ;;  %v2596_v17 = vsub.s32 (!%p288_p2), 0, %v342_v16  ;;  %v2598_v18 = vsub.s32 (!%p288_p2), 4, %v342_v16  ;;  %v2600_v19 = vsub.s32 (!%p288_p2), 1, %v342_v16  ;;  %v2602_v20 = vsub.s32 (!%p288_p2), 5, %v342_v16  ;;  %s2470_s17 = smov (!%p288_p2), 111  }
   0xc   : > { %414 = vperm.xlu1 (!%p288_p2), %2291, %v334_v0   ;;  %v2605_v22 = vsub.s32 (!%p288_p2), 2, %v342_v16  ;;  %v2607_v23 = vsub.s32 (!%p288_p2), 6, %v342_v16  ;;  %v2613_v30 = vsub.s32 (!%p288_p2), 3, %v342_v16  ;;  %v2615_v31 = vsub.s32 (!%p288_p2), 7, %v342_v16 }
   0xd   : > { %s2979_s10 = smov (!%p323_p3, %s2103_s10), 1 }
   0xe   : > { %s2172_s26 = sshll.u32 %s2979_s10, 3 }
   0xf   : > { %2293 = vset.pattern.permute.xlu0 %v2457_v6  ;;  %s2594_s29 = scalar_lea.vmem %s2958_s0, %s2172_s26 }
  0x10   : > { %2292 = vset.pattern.permute.xlu1 %v2455_v2  ;;  %362 = vperm.xlu0 %2293, %v334_v0   ;;  %v333_v21 = vld [vmem:[%s2594_s29] sm:$0xff] }
  0x11   : > { %442 = vperm.xlu1 %2292, %v439_v5   ;;  %v344_v26 = vrot.slane %v333_v21, %v2596_v17  ;;  %v348_v27 = vrot.slane %v333_v21, %v2598_v18  ;;  %v368_v28 = vrot.slane %v333_v21, %v2600_v19  ;;  %v372_v29 = vrot.slane %v333_v21, %v2602_v20 }
  0x12   : > { %v394_v32 = vrot.slane %v333_v21, %v2605_v22  ;;  %v398_v33 = vrot.slane %v333_v21, %v2607_v23  ;;  %v420_v40 = vrot.slane %v333_v21, %v2613_v30  ;;  %v424_v41 = vrot.slane %v333_v21, %v2615_v31 }
  0x13   : > { %v354_v34 = vrot.slane %v344_v26, %v2596_v17  ;;  %v358_v35 = vrot.slane %v348_v27, %v2596_v17  ;;  %v378_v38 = vrot.slane %v368_v28, %v2600_v19  ;;  %v382_v39 = vrot.slane %v372_v29, %v2600_v19 }
  0x14   : > { %482 = vperm.xlu0 %2293, %v454_v7   ;;  %v404_v42 = vrot.slane %v394_v32, %v2605_v22  ;;  %v408_v43 = vrot.slane %v398_v33, %v2605_v22  ;;  %v430_v50 = vrot.slane %v420_v40, %v2613_v30  ;;  %v434_v51 = vrot.slane %v424_v41, %v2613_v30 }
  0x15   : > { %462 = vperm.xlu1 %2292, %v454_v7  }
  0x18   : > { %2296 = vset.pattern.permute.xlu0 %v2456_v4 }
  0x19   : > { %2294 = vset.pattern.permute.xlu1 %v2457_v6  ;;  %526 = vperm.xlu0 %2296, %v453_v3  }
  0x1a   : > { %478 = vperm.xlu1 %2294, %v453_v3  }
  0x1d   : > { %2299 = vset.pattern.permute.xlu0 %v2458_v8 }
  0x1e   : > { %2295 = vset.pattern.permute.xlu1 %v2454_v1  ;;  %554 = vperm.xlu0 %2299, %v454_v7  }
  0x1f   : > { %502 = vperm.xlu1 %2295, %v453_v3  }
  0x22   : > { %2301 = vset.pattern.permute.xlu0 %v2459_v9 }
  0x23   : > { %506 = vperm.xlu1 %2295, %v454_v7   ;;  %598 = vperm.xlu0 %2301, %v453_v3  }
  0x27   : > { %2297 = vset.pattern.permute.xlu1 %v2456_v4  ;;  %2304 = vset.pattern.permute.xlu0 %v2460_v10 }
  0x28   : > { %530 = vperm.xlu1 %2297, %v454_v7   ;;  %626 = vperm.xlu0 %2304, %v454_v7  }
  0x2c   : > { %2298 = vset.pattern.permute.xlu1 %v2458_v8  ;;  %2426 = vset.pattern.permute.xlu0 %v2455_v2 }
  0x2d   : > { %550 = vperm.xlu1 %2298, %v453_v3   ;;  %2307 = vrot.lane.b32.xlu0 %v2462_v12, %s2463_s21 }
  0x31   : > { %2300 = vset.pattern.permute.xlu1 %v2461_v11  ;;  %2312 = vrot.lane.b32.xlu0 %v2462_v12, %s2464_s24 }
  0x32   : > { %574 = vperm.xlu1 %2300, %v453_v3  }
  0x35   : > { %2317 = vrot.lane.b32.xlu0 %v2462_v12, %s2465_s25 }
  0x36   : > { %578 = vperm.xlu1 %2300, %v454_v7  }
  0x3a   : > { %2302 = vset.pattern.permute.xlu1 %v2459_v9 }
  0x3b   : > { %602 = vperm.xlu1 %2302, %v454_v7  }
  0x3f   : > { %2303 = vset.pattern.permute.xlu1 %v2460_v10 }
  0x40   : > { %622 = vperm.xlu1 %2303, %v453_v3  }
  0x44   : > { %2305 = vset.pattern.permute.xlu1 %v2455_v2 }
  0x45   : > { %649 = vperm.xlu1 %2305, %v645_v13  }
  0x49   : > { %654 = vperm.xlu1 %2305, %v646_v14  }
  0x86   : > { %v389_v24 = vpop.permute.xlu1 %388  ;;  %v338_v25 = vpop.permute.xlu0 %337 }
  0x87   : > { %v359_v44 = vmul.f32 %v354_v34, %v338_v25  ;;  %v360_v45 = vmul.f32 %v358_v35, %v338_v25  ;;  %v409_v52 = vmul.f32 %v404_v42, %v389_v24  ;;  %v410_v53 = vmul.f32 %v408_v43, %v389_v24 }
  0x8a   : > { %v458_v36 = vpop.permute.xlu0 %457 }
  0x8b   : > { %v415_v37 = vpop.permute.xlu1 %414 }
  0x8c   : > { %v435_v59 = vmul.f32 %v430_v50, %v415_v37  ;;  %v436_v60 = vmul.f32 %v434_v51, %v415_v37 }
  0x8f   : > { %v363_v46 = vpop.permute.xlu0 %362 }
  0x90   : > { %v383_v47 = vmul.f32 %v378_v38, %v363_v46  ;;  %v384_v48 = vmul.f32 %v382_v39, %v363_v46  ;;  %v443_v49 = vpop.permute.xlu1 %442 }
  0x92   : > { %v385_v54 = vadd.f32 %v383_v47, %v359_v44  ;;  %v386_v55 = vadd.f32 %v384_v48, %v360_v45 }
  0x93   : > { %v483_v29 = vpop.permute.xlu0 %482 }
  0x94   : > { %v411_v56 = vadd.f32 %v409_v52, %v385_v54  ;;  %v412_v57 = vadd.f32 %v410_v53, %v386_v55  ;;  %v463_v58 = vpop.permute.xlu1 %462 }
  0x96   : > { %v437_v61 = vadd.f32 %v435_v59, %v411_v56  ;;  %v438_v62 = vadd.f32 %v436_v60, %v412_v57 }
  0x98   : > { %v445_v0 = vadd.f32 %v443_v49, %v437_v61  ;;  %v446_v3 = vadd.f32 %v443_v49, %v438_v62  ;;  %v527_v40 = vpop.permute.xlu0 %526 }
  0x99   : > { %v479_v63 = vpop.permute.xlu1 %478 }
  0x9a   : > { %v449_v7 = vmul.f32 0.3, %v445_v0  ;;  %v450_v13 = vmul.f32 0.3, %v446_v3  ;;  %vm447_vm0 = vcmp.gt.f32.partialorder %v445_v0, 0.0  ;;  %vm448_vm1 = vcmp.gt.f32.partialorder %v446_v3, 0.0 }
  0x9c   : > { %v2629_v16 = vsel %vm447_vm0, %v445_v0, %v449_v7  ;;  %v2631_v21 = vsel %vm448_vm1, %v446_v3, %v450_v13  ;;  %vm1412_vm0 = vcmask 924672  }
  0x9d   : > { %v468_v24 = vrot.slane %v2629_v16, %v2596_v17  ;;  %v472_v25 = vrot.slane %v2631_v21, %v2596_v17  ;;  %v488_v26 = vrot.slane %v2629_v16, %v2600_v19  ;;  %v492_v27 = vrot.slane %v2631_v21, %v2600_v19  ;;  %v555_v57 = vpop.permute.xlu0 %554 }
  0x9e   : > { %v503_v5 = vpop.permute.xlu1 %502  ;;  %v512_v38 = vrot.slane %v2629_v16, %v2605_v22  ;;  %v516_v39 = vrot.slane %v2631_v21, %v2605_v22  ;;  %v536_v43 = vrot.slane %v2629_v16, %v2613_v30  ;;  %v540_v44 = vrot.slane %v2631_v21, %v2613_v30 }
  0x9f   : > { %v473_v32 = vmul.f32 %v468_v24, %v458_v36  ;;  %v474_v33 = vmul.f32 %v472_v25, %v458_v36  ;;  %v493_v34 = vmul.f32 %v488_v26, %v479_v63  ;;  %v494_v35 = vmul.f32 %v492_v27, %v479_v63 }
  0xa0   : > { %v517_v45 = vmul.f32 %v512_v38, %v503_v5  ;;  %v518_v36 = vmul.f32 %v516_v39, %v503_v5  ;;  %v475_v47 = vmul.f32 %v468_v24, %v463_v58  ;;  %v476_v48 = vmul.f32 %v472_v25, %v463_v58 }
  0xa1   : > { %v497_v41 = vadd.f32 %v493_v34, %v473_v32  ;;  %v498_v42 = vadd.f32 %v494_v35, %v474_v33  ;;  %v495_v49 = vmul.f32 %v488_v26, %v483_v29  ;;  %v496_v50 = vmul.f32 %v492_v27, %v483_v29 }
  0xa2   : > { %v507_v14 = vpop.permute.xlu1 %506  ;;  %v560_v53 = vrot.slane %v2629_v16, %v2598_v18  ;;  %v564_v54 = vrot.slane %v2631_v21, %v2598_v18  ;;  %v541_v55 = vmul.f32 %v536_v43, %v527_v40  ;;  %v542_v56 = vmul.f32 %v540_v44, %v527_v40  ;;  %v599_v34 = vpop.permute.xlu0 %598 }
  0xa3   : > { %v521_v51 = vadd.f32 %v517_v45, %v497_v41  ;;  %v522_v52 = vadd.f32 %v518_v36, %v498_v42  ;;  %v519_v59 = vmul.f32 %v512_v38, %v507_v14  ;;  %v520_v60 = vmul.f32 %v516_v39, %v507_v14 }
  0xa4   : > { %v584_v58 = vrot.slane %v2629_v16, %v2602_v20  ;;  %v588_v63 = vrot.slane %v2631_v21, %v2602_v20  ;;  %v499_v3 = vadd.f32 %v495_v49, %v475_v47  ;;  %v500_v5 = vadd.f32 %v496_v50, %v476_v48 }
  0xa5   : > { %v545_v24 = vadd.f32 %v541_v55, %v521_v51  ;;  %v546_v25 = vadd.f32 %v542_v56, %v522_v52  ;;  %v608_v39 = vrot.slane %v2629_v16, %v2607_v23  ;;  %v612_v40 = vrot.slane %v2631_v21, %v2607_v23 }
  0xa6   : > { %v523_v29 = vadd.f32 %v519_v59, %v499_v3  ;;  %v524_v32 = vadd.f32 %v520_v60, %v500_v5  ;;  %v567_v42 = vmul.f32 %v560_v53, %v555_v57  ;;  %v632_v47 = vrot.slane %v2629_v16, %v2615_v31 }
  0xa7   : > { %v531_v28 = vpop.permute.xlu1 %530  ;;  %v613_v36 = vmul.f32 %v608_v39, %v599_v34  ;;  %v636_v48 = vrot.slane %v2631_v21, %v2615_v31 }
  0xa8   : > { %v543_v7 = vmul.f32 %v536_v43, %v531_v28  ;;  %v544_v13 = vmul.f32 %v540_v44, %v531_v28  ;;  %v568_v43 = vmul.f32 %v564_v54, %v555_v57 }
  0xaa   : > { %v547_v35 = vadd.f32 %v543_v7, %v523_v29 }
  0xac   : > { %v551_v37 = vpop.permute.xlu1 %550  ;;  %v571_v49 = vadd.f32 %v567_v42, %v547_v35 }
  0xad   : > { %v565_v61 = vmul.f32 %v560_v53, %v551_v37  ;;  %v566_v62 = vmul.f32 %v564_v54, %v551_v37  ;;  %v548_v37 = vadd.f32 %v544_v13, %v524_v32 }
  0xaf   : > { %v569_v14 = vadd.f32 %v565_v61, %v545_v24  ;;  %v570_v33 = vadd.f32 %v566_v62, %v546_v25  ;;  %v572_v50 = vadd.f32 %v568_v43, %v548_v37  ;;  %v627_v61 = vpop.permute.xlu0 %626 }
  0xb0   : > { %v639_v16 = vmul.f32 %v632_v47, %v627_v61  ;;  %v640_v3 = vmul.f32 %v636_v48, %v627_v61 }
  0xb1   : > { %v575_v46 = vpop.permute.xlu1 %574 }
  0xb2   : > { %v589_v26 = vmul.f32 %v584_v58, %v575_v46  ;;  %v590_v27 = vmul.f32 %v588_v63, %v575_v46  ;;  %v614_v46 = vmul.f32 %v612_v40, %v599_v34 }
  0xb4   : > { %v593_v41 = vadd.f32 %v589_v26, %v569_v14  ;;  %v594_v28 = vadd.f32 %v590_v27, %v570_v33 }
  0xb5   : > { %v579_v0 = vpop.permute.xlu1 %578 }
  0xb6   : > { %v591_v44 = vmul.f32 %v584_v58, %v579_v0  ;;  %v592_v45 = vmul.f32 %v588_v63, %v579_v0  ;;  %v617_v56 = vadd.f32 %v613_v36, %v593_v41  ;;  %v618_v59 = vadd.f32 %v614_v46, %v594_v28  ;;  %v1769_v36 = vld [vmem:[%s2965_s7] sm:$0xf] }
  0xb7   : > { %v1741_v46 = vld [vmem:[%s2964_s6] sm:$0xff] }
  0xb8   : > { %v595_v60 = vadd.f32 %v591_v44, %v571_v49  ;;  %v596_v53 = vadd.f32 %v592_v45, %v572_v50  ;;  %v2138_v44 = vld [vmem:[%s2963_s5 + $0x40] sm:$0xff]  ;;  %v2477_v49 = vmov 14  }
  0xba   : > { %v603_v38 = vpop.permute.xlu1 %602 }
  0xbb   : > { %v615_v51 = vmul.f32 %v608_v39, %v603_v38  ;;  %v616_v52 = vmul.f32 %v612_v40, %v603_v38 }
  0xbd   : > { %v619_v62 = vadd.f32 %v615_v51, %v595_v60  ;;  %v620_v58 = vadd.f32 %v616_v52, %v596_v53  ;;  %v2478_v51 = vmov 15   ;;  %v686_v52 = vand.u32 127, %v341_v15 }
  0xbf   : > { %v623_v55 = vpop.permute.xlu1 %622  ;;  %v643_v13 = vadd.f32 %v639_v16, %v619_v62  ;;  %v644_v24 = vadd.f32 %v640_v3, %v620_v58 }
  0xc0   : > { %v637_v54 = vmul.f32 %v632_v47, %v623_v55  ;;  %v638_v57 = vmul.f32 %v636_v48, %v623_v55  ;;  %v1742_v47 = vld [vmem:[%s2964_s6 + $0x8] sm:$0xff]  ;;  %v2476_v48 = vmov 12  }
  0xc2   : > { %v641_v63 = vadd.f32 %v637_v54, %v617_v56  ;;  %v642_v0 = vadd.f32 %v638_v57, %v618_v59  ;;  %v687_v56 = vadd.s32 128, %v686_v52 }
  0xc4   : > { %v650_v5 = vpop.permute.xlu1 %649  ;;  %v699_v61 = vand.u32 15, %v687_v56 }
  0xc5   : > { %v657_v21 = vadd.f32 %v650_v5, %v641_v63  ;;  %v658_v7 = vadd.f32 %v650_v5, %v642_v0 }
  0xc6   : > { %vm715_vm8 = vcmp.le.s32.totalorder %v699_v61, 14  ;;  %vm713_vm13 = vcmp.ge.s32.totalorder %v699_v61, 1 }
  0xc7   : > { %vm661_vm2 = vcmp.gt.f32.partialorder %v657_v21, 0.0  ;;  %vm662_vm3 = vcmp.gt.f32.partialorder %v658_v7, 0.0  ;;  %v665_v25 = vmul.f32 0.3, %v657_v21  ;;  %v666_v26 = vmul.f32 0.3, %v658_v7  ;;  %vm2717_vm9 = vmpackc.low %vm715_vm8, %vm715_vm8 }
  0xc8   : > { %v655_v27 = vpop.permute.xlu1 %654  ;;  %vm2753_vm15 = vmpackc.low %vm713_vm13, %vm713_vm13 }
  0xc9   : > { %v669_v29 = vsel %vm661_vm2, %v657_v21, %v665_v25  ;;  %v670_v32 = vsel %vm662_vm3, %v658_v7, %v666_v26  ;;  %v659_v14 = vadd.f32 %v655_v27, %v643_v13  ;;  %v660_v33 = vadd.f32 %v655_v27, %v644_v24 }
  0xca   : > { %v2321_v34 = vpack.i.bf16 %v670_v32, %v669_v29  ;;  %v2331_v42 = vpack.i.bf16 %v2462_v12, %v670_v32  ;;  %v692_v25 = vand.u32 15, %v686_v52  ;;  %vm965_vm2 = vcmask 121856  }
  0xcb   : > { %vm663_vm4 = vcmp.gt.f32.partialorder %v659_v14, 0.0  ;;  %vm664_vm5 = vcmp.gt.f32.partialorder %v660_v33, 0.0  ;;  %v667_v35 = vmul.f32 0.3, %v659_v14  ;;  %v668_v37 = vmul.f32 0.3, %v660_v33 }
  0xcc   : > { %2322 = vrot.lane.b32.xlu0 %v2321_v34, %s2463_s21  ;;  %vm714_vm10 = vcmp.le.s32.totalorder %v692_v25, 14  ;;  %vm2739_vm14 = vcmp.ge.s32.totalorder %v692_v25, 1  ;;  %vm1530_vm3 = vcmask 916480  }
  0xcd   : > { %v671_v38 = vsel %vm663_vm4, %v659_v14, %v667_v35  ;;  %v672_v39 = vsel %vm664_vm5, %v660_v33, %v668_v37  ;;  %vm2730_vm12 = vmpackc.low %vm714_vm10, %vm714_vm10  ;;  %vm1080_vm4 = vcmask 7168   ;;  %vm1638_vm5 = vcmask 908288   ;;  %v2162_v33 = vld [vmem:[%s2963_s5 + $0x80] sm:$0xff] }
  0xce   : > { %v2666_v40 = vpack.c.bf16 %v672_v39, %v670_v32  ;;  %v2326_v41 = vpack.i.bf16 %v672_v39, %v671_v38  ;;  %v2668_v28 = vpack.c.bf16 %v671_v38, %v669_v29  ;;  %v2336_v43 = vpack.i.bf16 %v2462_v12, %v672_v39  ;;  %vm2761_vm1 = vmpackc.low %vm2739_vm14, %vm2739_vm14 }
  0xcf   : > { %v2341_v45 = vpack.i.bf16 %v671_v38, %v669_v29 }
  0xd0   : > { %2197 = vmatprep.subr.bf16.mxu0 %v2666_v40  ;;  %2327 = vrot.lane.b32.xlu1 %v2326_v41, %s2463_s21 }
  0xd1   : > { %2332 = vrot.lane.b32.xlu0 %v2331_v42, %s2466_s11  ;;  %2199 = vmatpush1.bf16.msra.mxu0 %v2668_v28 }
  0xd4   : > { %2337 = vrot.lane.b32.xlu1 %v2336_v43, %s2466_s11  ;;  %2140 = vmatmul.mubr.msk.f32.vlgmr.msra.gmra.mrb[0].mxu0 %vm774_vm6, %v2138_v44 }
  0xd5   : > { %2347 = vrot.lane.b32.xlu0 %v2321_v34, %s2464_s24  ;;  %1383 = vmatprep.mubr.f32.mxu0 %v2462_v12 }
  0xd8   : > { %2342 = vrot.lane.b32.xlu1 %v2341_v45, %s2466_s11  ;;  %s332_s11 = scalar_lea.vmem %s2967_s9, %s2172_s26 }
  0xd9   : > { %2357 = vrot.lane.b32.xlu0 %v2331_v42, %s2467_s14 }
  0xdc   : > { %2352 = vrot.lane.b32.xlu1 %v2326_v41, %s2464_s24 }
  0xdd   : > { %2372 = vrot.lane.b32.xlu0 %v2321_v34, %s2465_s25 }
  0xe0   : > { %2362 = vrot.lane.b32.xlu1 %v2336_v43, %s2467_s14 }
  0xe1   : > { %2382 = vrot.lane.b32.xlu0 %v2331_v42, %s2468_s15 }
  0xe4   : > { %2367 = vrot.lane.b32.xlu1 %v2341_v45, %s2467_s14 }
  0xe5   : > { %2397 = vrot.lane.b32.xlu0 %v2321_v34, %s2469_s16  ;;  %v2112_v34 = vld [vmem:[%s2963_s5 + $0x10] sm:$0xff] }
  0xe8   : > { %2377 = vrot.lane.b32.xlu1 %v2326_v41, %s2465_s25 }
  0xe9   : > { %2407 = vrot.lane.b32.xlu0 %v2331_v42, %s2470_s17 }
  0xec   : > { %2387 = vrot.lane.b32.xlu1 %v2336_v43, %s2468_s15 }
  0xed   : > { %2412 = vrot.lane.b32.xlu0 %v2462_v12, %s2469_s16 }
  0xf0   : > { %2392 = vrot.lane.b32.xlu1 %v2341_v45, %s2468_s15 }
  0xf1   : > { %1745 = vperm.xlu0 %2426, %v1741_v46  }
  0xf4   : > { %2402 = vrot.lane.b32.xlu1 %v2326_v41, %s2469_s16 }
  0xf5   : > { %2428 = vset.pattern.permute.xlu0 %v2454_v1  ;;  %v2471_v1 = vmov 10  }
  0xf6   : > { %1802 = vperm.xlu0 %2428, %v1769_v36  }
  0xf8   : > { %2417 = vrot.lane.b32.xlu1 %v2336_v43, %s2470_s17 }
  0xfa   : > { %2431 = vset.pattern.permute.xlu0 %v2455_v2 }
  0xfb   : > { %1750 = vperm.xlu0 %2431, %v1742_v47   ;;  %v2113_v47 = vld [vmem:[%s2963_s5 + $0x18] sm:$0xff] }
  0xfc   : > { %2422 = vrot.lane.b32.xlu1 %v2341_v45, %s2470_s17 }
  0xff   : > { %2434 = vset.pattern.permute.xlu0 %v2460_v10  ;;  %v2474_v10 = vmov 9  }
 0x100   : > { %1772 = vperm.xlu1 %2305, %v1769_v36   ;;  %1882 = vperm.xlu0 %2434, %v1769_v36  }
 0x104   : > { %2427 = vset.pattern.permute.xlu1 %v2457_v6  ;;  %2437 = vset.pattern.permute.xlu0 %v2471_v1  ;;  %v2472_v6 = vmov 13  }
 0x105   : > { %1786 = vperm.xlu1 %2427, %v1769_v36   ;;  %1930 = vperm.xlu0 %2437, %v1769_v36  }
 0x109   : > { %2429 = vset.pattern.permute.xlu1 %v2456_v4  ;;  %2440 = vset.pattern.permute.xlu0 %v2472_v6  ;;  %v2025_v4 = vld [vmem:[%s2966_s8] sm:$0xf] }
 0x10a   : > { %1818 = vperm.xlu1 %2429, %v1769_v36   ;;  %1978 = vperm.xlu0 %2440, %v1769_v36  }
 0x10e   : > { %2430 = vset.pattern.permute.xlu1 %v2458_v8  ;;  %v2473_v8 = vmov 8   ;;  %2443 = vset.pattern.permute.xlu0 %v2455_v2 }
 0x10f   : > { %1834 = vperm.xlu1 %2430, %v1769_v36   ;;  %2028 = vperm.xlu0 %2443, %v2025_v4  }
 0x113   : > { %2432 = vset.pattern.permute.xlu1 %v2461_v11  ;;  %v2475_v11 = vmov 11  }
 0x114   : > { %1850 = vperm.xlu1 %2432, %v1769_v36  }
 0x118   : > { %2433 = vset.pattern.permute.xlu1 %v2459_v9  ;;  %v2308_v9 = vpop.permute.xlu0 %2307 }
 0x119   : > { %1866 = vperm.xlu1 %2433, %v1769_v36   ;;  %v2309_v59 = vunpack.i.l.bf16 %v2308_v9  ;;  %v2310_v54 = vunpack.i.h.bf16 %v2308_v9 }
 0x11c   : > { %v2706_v50 = vpop.permute.xlu0 %2312 }
 0x11d   : > { %2435 = vset.pattern.permute.xlu1 %v2473_v8  ;;  %v2314_v42 = vunpack.i.l.bf16 %v2706_v50  ;;  %v2315_v4 = vunpack.i.h.bf16 %v2706_v50  ;;  %v2142_v50 = vld [vmem:[%s2963_s5 + $0x50] sm:$0xff] }
 0x11e   : > { %1898 = vperm.xlu1 %2435, %v1769_v36  }
 0x120   : > { %v2708_v2 = vpop.permute.xlu0 %2317 }
 0x122   : > { %2436 = vset.pattern.permute.xlu1 %v2474_v10 }
 0x123   : > { %1914 = vperm.xlu1 %2436, %v1769_v36  }
 0x127   : > { %2438 = vset.pattern.permute.xlu1 %v2475_v11 }
 0x128   : > { %1946 = vperm.xlu1 %2438, %v1769_v36  }
 0x12c   : > { %2439 = vset.pattern.permute.xlu1 %v2476_v48 }
 0x12d   : > { %1962 = vperm.xlu1 %2439, %v1769_v36  }
 0x131   : > { %2441 = vset.pattern.permute.xlu1 %v2477_v49 }
 0x132   : > { %1994 = vperm.xlu1 %2441, %v1769_v36  }
 0x136   : > { %2442 = vset.pattern.permute.xlu1 %v2478_v51 }
 0x137   : > { %2010 = vperm.xlu1 %2442, %v1769_v36  }
 0x13e   : > { %v2323_v55 = vpop.permute.xlu0 %2322 }
 0x13f   : > { %v2325_v60 = vunpack.i.h.bf16 %v2323_v55  ;;  %v2324_v53 = vunpack.i.l.bf16 %v2323_v55 }
 0x141   : > { %v776_v0 = vsel %vm774_vm6, %v2324_v53, %v2325_v60  ;;  %v775_v16 = vsel %vm774_vm6, %v2309_v59, %v2324_v53 }
 0x142   : > { %v2328_v57 = vpop.permute.xlu1 %2327 }
 0x143   : > { %v2330_v62 = vunpack.i.h.bf16 %v2328_v57  ;;  %v2329_v58 = vunpack.i.l.bf16 %v2328_v57  ;;  %v2333_v63 = vpop.permute.xlu0 %2332 }
 0x144   : > { %v2335_v3 = vunpack.i.h.bf16 %v2333_v63  ;;  %v2334_v5 = vunpack.i.l.bf16 %v2333_v63  ;;  %v2143_v63 = vld [vmem:[%s2963_s5 + $0x58] sm:$0xff] }
 0x145   : > { %v778_v15 = vsel %vm774_vm6, %v2329_v58, %v2330_v62  ;;  %v777_v21 = vsel %vm774_vm6, %v2310_v54, %v2329_v58 }
 0x146   : > { %v2338_v7 = vpop.permute.xlu1 %2337  ;;  %v2174_v13 = vpack.c.bf16 %v778_v15, %v776_v0  ;;  %v2176_v24 = vpack.c.bf16 %v777_v21, %v775_v16  ;;  %v1299_v32 = vsel %vm1297_vm7, %v2334_v5, %v2335_v3  ;;  %v757_v3 = vld [vmem:[%s2963_s5] sm:$0xff] }
 0x147   : > { %v2340_v26 = vunpack.i.h.bf16 %v2338_v7  ;;  %v2339_v27 = vunpack.i.l.bf16 %v2338_v7  ;;  %v2348_v29 = vpop.permute.xlu0 %2347 }
 0x148   : > { %2175 = vmatprep.subr.bf16.mxu1 %v2174_v13  ;;  %v2350_v43 = vunpack.i.h.bf16 %v2348_v29  ;;  %v2349_v44 = vunpack.i.l.bf16 %v2348_v29  ;;  %v758_v29 = vld [vmem:[%s2963_s5 + $0x8] sm:$0xff] }
 0x149   : > { %v1301_v14 = vsel %vm1297_vm7, %v2339_v27, %v2340_v26  ;;  %2177 = vmatpush1.bf16.msra.mxu1 %v2176_v24 }
 0x14a   : > { %v2200_v35 = vpack.c.bf16 %v1301_v14, %v1299_v32  ;;  %v2343_v37 = vpop.permute.xlu1 %2342  ;;  %v745_v48 = vsel %vm744_vm11, %v2314_v42, %v2349_v44  ;;  %v746_v49 = vsel %vm744_vm11, %v2349_v44, %v2350_v43  ;;  %v2319_v32 = vunpack.i.l.bf16 %v2708_v2  ;;  %v2150_v43 = vld [vmem:[%s2963_s5 + $0x60] sm:$0xff] }
 0x14b   : > { %v2345_v38 = vunpack.i.h.bf16 %v2343_v37  ;;  %v2344_v39 = vunpack.i.l.bf16 %v2343_v37  ;;  %v2358_v41 = vpop.permute.xlu0 %2357 }
 0x14c   : > { %2202 = vmatprep.subr.msk.bf16.mxu0 %vm2717_vm9, %v2200_v35  ;;  %2114 = vmatmul.mubr.msk.f32.vlgmr.msra.gmra.mrb[0].mxu1 %vm774_vm6, %v2112_v34  ;;  %v2360_v51 = vunpack.i.h.bf16 %v2358_v41  ;;  %v2359_v52 = vunpack.i.l.bf16 %v2358_v41  ;;  %v2320_v35 = vunpack.i.h.bf16 %v2708_v2 }
 0x14d   : > { %v1300_v45 = vsel %vm1297_vm7, %v2345_v38, %v2339_v27  ;;  %v1298_v36 = vsel %vm1297_vm7, %v2344_v39, %v2334_v5  ;;  %859 = vmatprep.mubr.f32.mxu1 %v2462_v12 }
 0x14e   : > { %v2203_v1 = vpack.c.bf16 %v1300_v45, %v1298_v36  ;;  %v2353_v6 = vpop.permute.xlu1 %2352  ;;  %v1414_v0 = vsel %vm1412_vm0, %v2359_v52, %v2360_v51 }
 0x14f   : > { %v2355_v8 = vunpack.i.h.bf16 %v2353_v6  ;;  %v2354_v10 = vunpack.i.l.bf16 %v2353_v6  ;;  %v2373_v11 = vpop.permute.xlu0 %2372 }
 0x150   : > { %2205 = vmatpush1.bf16.msk.msra.mxu0 %vm2730_vm12, %v2203_v1  ;;  %2115 = vmatmul.mubr.msk.f32.gmra.mrb[2].mxu1 %vm774_vm6, %v2113_v47  ;;  %v2375_v24 = vunpack.i.h.bf16 %v2373_v11  ;;  %v2374_v25 = vunpack.i.l.bf16 %v2373_v11 }
 0x151   : > { %v747_v55 = vsel %vm744_vm11, %v2315_v4, %v2354_v10  ;;  %v748_v56 = vsel %vm744_vm11, %v2354_v10, %v2355_v8  ;;  %936 = vmatprep.mubr.f32.mxu1 %v2462_v12  ;;  %v2151_v10 = vld [vmem:[%s2963_s5 + $0x68] sm:$0xff] }
 0x152   : > { %v2178_v60 = vpack.c.bf16 %v748_v56, %v746_v49  ;;  %v2181_v53 = vpack.c.bf16 %v747_v55, %v745_v48  ;;  %v2363_v54 = vpop.permute.xlu1 %2362  ;;  %v966_v39 = vsel %vm965_vm2, %v2319_v32, %v2374_v25  ;;  %v967_v41 = vsel %vm965_vm2, %v2374_v25, %v2375_v24  ;;  %v2122_v48 = vld [vmem:[%s2963_s5 + $0x20] sm:$0xff] }
 0x153   : > { %v2365_v61 = vunpack.i.h.bf16 %v2363_v54  ;;  %v2364_v62 = vunpack.i.l.bf16 %v2363_v54  ;;  %v2765_v58 = vpop.permute.xlu0 %2382  ;;  %2148 = vmatmul.mubr.msk.f32.vlgmr.msra.gmra.mrb[0].mxu0 %vm774_vm6, %v2142_v50 }
 0x154   : > { %2180 = vmatprep.subr.msk.bf16.mxu1 %vm2753_vm15, %v2178_v60  ;;  %1389 = vmatprep.mubr.f32.mxu0 %v2462_v12  ;;  %v2385_v44 = vunpack.i.h.bf16 %v2765_v58  ;;  %v2384_v2 = vunpack.i.l.bf16 %v2765_v58  ;;  %v2123_v58 = vld [vmem:[%s2963_s5 + $0x28] sm:$0xff] }
 0x155   : > { %v1416_v16 = vsel %vm1412_vm0, %v2364_v62, %v2365_v61  ;;  %2183 = vmatpush1.bf16.msk.msra.mxu1 %vm2761_vm1, %v2181_v53 }
 0x156   : > { %v2206_v5 = vpack.c.bf16 %v1416_v16, %v1414_v0  ;;  %v2368_v15 = vpop.permute.xlu1 %2367  ;;  %v1532_v11 = vsel %vm1530_vm3, %v2384_v2, %v2385_v44 }
 0x157   : > { %v2370_v21 = vunpack.i.h.bf16 %v2368_v15  ;;  %v2369_v7 = vunpack.i.l.bf16 %v2368_v15  ;;  %v2781_v13 = vpop.permute.xlu0 %2397  ;;  %2149 = vmatmul.mubr.msk.f32.gmra.mrb[2].mxu0 %vm774_vm6, %v2143_v63 }
 0x158   : > { %2208 = vmatprep.subr.msk.bf16.mxu0 %vm2753_vm15, %v2206_v5  ;;  %2120 = vmatmul.mubr.msk.f32.vlgmr.msra.gmra.mrb[0].mxu1 %vm774_vm6, %v757_v3  ;;  %v2400_v56 = vunpack.i.h.bf16 %v2781_v13  ;;  %v2399_v60 = vunpack.i.l.bf16 %v2781_v13 }
 0x159   : > { %v1413_v26 = vsel %vm1412_vm0, %v2369_v7, %v2359_v52  ;;  %v1415_v27 = vsel %vm1412_vm0, %v2370_v21, %v2364_v62  ;;  %942 = vmatprep.mubr.f32.mxu1 %v2462_v12  ;;  %1498 = vmatprep.mubr.f32.mxu0 %v2462_v12  ;;  %v2158_v21 = vld [vmem:[%s2963_s5 + $0x70] sm:$0xff] }
 0x15a   : > { %v2209_v14 = vpack.c.bf16 %v1415_v27, %v1413_v26  ;;  %v2378_v34 = vpop.permute.xlu1 %2377  ;;  %v1082_v5 = vsel %vm1080_vm4, %v2399_v60, %v2400_v56 }
 0x15b   : > { %v2380_v37 = vunpack.i.h.bf16 %v2378_v34  ;;  %v2379_v38 = vunpack.i.l.bf16 %v2378_v34  ;;  %v2798_v42 = vpop.permute.xlu0 %2407  ;;  %v2159_v34 = vld [vmem:[%s2963_s5 + $0x78] sm:$0xff] }
 0x15c   : > { %2211 = vmatpush1.bf16.msk.msra.mxu0 %vm2761_vm1, %v2209_v14  ;;  %2121 = vmatmul.mubr.msk.f32.gmra.mrb[2].mxu1 %vm774_vm6, %v758_v29  ;;  %v2410_v15 = vunpack.i.h.bf16 %v2798_v42  ;;  %v2409_v7 = vunpack.i.l.bf16 %v2798_v42 }
 0x15d   : > { %v968_v45 = vsel %vm965_vm2, %v2320_v35, %v2379_v38  ;;  %v969_v36 = vsel %vm965_vm2, %v2379_v38, %v2380_v37  ;;  %1051 = vmatprep.mubr.f32.mxu1 %v2462_v12  ;;  %v2130_v38 = vld [vmem:[%s2963_s5 + $0x30] sm:$0xff] }
 0x15e   : > { %v2184_v47 = vpack.c.bf16 %v969_v36, %v967_v41  ;;  %v2187_v1 = vpack.c.bf16 %v968_v45, %v966_v39  ;;  %v2388_v6 = vpop.permute.xlu1 %2387  ;;  %v1640_v35 = vsel %vm1638_vm5, %v2409_v7, %v2410_v15 }
 0x15f   : > { %v2390_v4 = vunpack.i.h.bf16 %v2388_v6  ;;  %v2389_v8 = vunpack.i.l.bf16 %v2388_v6  ;;  %2156 = vmatmul.mubr.msk.f32.vlgmr.msra.gmra.mrb[0].mxu0 %vm774_vm6, %v2150_v43  ;;  %v2413_v49 = vpop.permute.xlu0 %2412 }
 0x160   : > { %2186 = vmatprep.subr.msk.bf16.mxu1 %vm2717_vm9, %v2184_v47  ;;  %1504 = vmatprep.mubr.f32.mxu0 %v2462_v12  ;;  %v2415_v53 = vunpack.i.h.bf16 %v2413_v49  ;;  %v2414_v54 = vunpack.i.l.bf16 %v2413_v49 }
 0x161   : > { %2189 = vmatpush1.bf16.msk.msra.mxu1 %vm2730_vm12, %v2187_v1  ;;  %v1534_v9 = vsel %vm1530_vm3, %v2389_v8, %v2390_v4 }
 0x162   : > { %v2393_v50 = vpop.permute.xlu1 %2392  ;;  %v2212_v51 = vpack.c.bf16 %v1534_v9, %v1532_v11  ;;  %v1081_v13 = vsel %vm1080_vm4, %v2414_v54, %v2399_v60 }
 0x163   : > { %v2395_v52 = vunpack.i.h.bf16 %v2393_v50  ;;  %v2394_v55 = vunpack.i.l.bf16 %v2393_v50  ;;  %2157 = vmatmul.mubr.msk.f32.gmra.mrb[2].mxu0 %vm774_vm6, %v2151_v10 }
 0x164   : > { %2213 = vmatprep.subr.bf16.mxu0 %v2212_v51  ;;  %2128 = vmatmul.mubr.msk.f32.vlgmr.msra.gmra.mrb[0].mxu1 %vm774_vm6, %v2122_v48 }
 0x165   : > { %v1531_v61 = vsel %vm1530_vm3, %v2394_v55, %v2384_v2  ;;  %v1533_v62 = vsel %vm1530_vm3, %v2395_v52, %v2389_v8  ;;  %1057 = vmatprep.mubr.f32.mxu1 %v2462_v12  ;;  %1609 = vmatprep.mubr.f32.mxu0 %v2462_v12  ;;  %v2139_v2 = vld [vmem:[%s2963_s5 + $0x48] sm:$0xff] }
 0x166   : > { %v2214_v63 = vpack.c.bf16 %v1533_v62, %v1531_v61  ;;  %v2403_v0 = vpop.permute.xlu1 %2402 }
 0x167   : > { %v2405_v16 = vunpack.i.h.bf16 %v2403_v0  ;;  %v2404_v3 = vunpack.i.l.bf16 %v2403_v0 }
 0x168   : > { %2215 = vmatpush1.bf16.msra.mxu0 %v2214_v63  ;;  %2129 = vmatmul.mubr.msk.f32.gmra.mrb[2].mxu1 %vm774_vm6, %v2123_v58 }
 0x169   : > { %v1083_v24 = vsel %vm1080_vm4, %v2415_v53, %v2404_v3  ;;  %v1084_v25 = vsel %vm1080_vm4, %v2404_v3, %v2405_v16  ;;  %1166 = vmatprep.mubr.f32.mxu1 %v2462_v12 }
 0x16a   : > { %v2190_v26 = vpack.c.bf16 %v1084_v25, %v1082_v5  ;;  %v2193_v27 = vpack.c.bf16 %v1083_v24, %v1081_v13  ;;  %v2418_v29 = vpop.permute.xlu1 %2417 }
 0x16b   : > { %v2420_v32 = vunpack.i.h.bf16 %v2418_v29  ;;  %v2419_v14 = vunpack.i.l.bf16 %v2418_v29  ;;  %2160 = vmatmul.mubr.msk.f32.vlgmr.msra.gmra.mrb[0].mxu0 %vm774_vm6, %v2158_v21 }
 0x16c   : > { %2192 = vmatprep.subr.msk.bf16.mxu1 %vm2753_vm15, %v2190_v26  ;;  %1615 = vmatprep.mubr.f32.mxu0 %v2462_v12 }
 0x16d   : > { %v1642_v37 = vsel %vm1638_vm5, %v2419_v14, %v2420_v32  ;;  %2195 = vmatpush1.bf16.msk.msra.mxu1 %vm2761_vm1, %v2193_v27 }
 0x16e   : > { %v2216_v39 = vpack.c.bf16 %v1642_v37, %v1640_v35  ;;  %v2423_v59 = vpop.permute.xlu1 %2422  ;;  %2222 = vmatprep.subr.bf16.mxu1 %v2666_v40  ;;  %v2131_v40 = vld [vmem:[%s2963_s5 + $0x38] sm:$0xff] }
 0x16f   : > { %v2425_v41 = vunpack.i.h.bf16 %v2423_v59  ;;  %v2424_v42 = vunpack.i.l.bf16 %v2423_v59  ;;  %2161 = vmatmul.mubr.msk.f32.gmra.mrb[2].mxu0 %vm774_vm6, %v2159_v34 }
 0x170   : > { %2136 = vmatmul.mubr.msk.f32.vlgmr.msra.gmra.mrb[0].mxu1 %vm774_vm6, %v2130_v38  ;;  %2218 = vmatprep.subr.msk.bf16.mxu0 %vm2717_vm9, %v2216_v39  ;;  %v1746_v4 = vpop.permute.xlu0 %1745 }
 0x171   : > { %v1639_v57 = vsel %vm1638_vm5, %v2424_v42, %v2409_v7  ;;  %v1641_v43 = vsel %vm1638_vm5, %v2425_v41, %v2419_v14  ;;  %2223 = vmatpush1.bf16.msra.mxu1 %v2668_v28  ;;  %1172 = vmatprep.mubr.f32.mxu1 %v2462_v12  ;;  %v2163_v28 = vld [vmem:[%s2963_s5 + $0x88] sm:$0xff] }
 0x172   : > { %v2219_v44 = vpack.c.bf16 %v1641_v43, %v1639_v57  ;;  %1724 = vmatprep.mubr.f32.mxu0 %v2462_v12 }
 0x174   : > { %2137 = vmatmul.mubr.msk.f32.gmra.mrb[2].mxu1 %vm774_vm6, %v2131_v40  ;;  %2221 = vmatpush1.bf16.msk.msra.mxu0 %vm2730_vm12, %v2219_v44 }
 0x175   : > { %1262 = vmatprep.mubr.f32.mxu1 %v2462_v12  ;;  %v1803_v11 = vpop.permute.xlu0 %1802 }
 0x177   : > { %2168 = vmatmul.mubr.msk.f32.vlgmr.msra.gmra.mrb[0].mxu0 %vm774_vm6, %v2162_v33 }
 0x178   : > { %1730 = vmatprep.mubr.f32.mxu0 %v2462_v12 }
 0x17a   : > { %v1751_v63 = vpop.permute.xlu0 %1750 }
 0x17b   : > { %2169 = vmatmul.mubr.msk.f32.gmra.mrb[2].mxu0 %vm774_vm6, %v2163_v28 }
 0x17c   : > { %2141 = vmatmul.mubr.msk.f32.vlgmr.msra.gmra.mrb[2].mxu1 %vm774_vm6, %v2139_v2 }
 0x17f   : > { %v1773_v46 = vpop.permute.xlu1 %1772 }
 0x184   : > { %v1787_v45 = vpop.permute.xlu1 %1786 }
 0x189   : > { %v1819_v36 = vpop.permute.xlu1 %1818 }
 0x18e   : > { %v1835_v47 = vpop.permute.xlu1 %1834 }
 0x193   : > { %v2891_v1 = vpop.permute.xlu1 %1850 }
 0x198   : > { %v2893_v8 = vpop.permute.xlu1 %1866 }
 0x19d   : > { %v2895_v51 = vpop.permute.xlu1 %1898 }
 0x1a2   : > { %v2903_v27 = vpop.permute.xlu1 %1914 }
 0x243   : > { %v1168_v6 = vpop.f32.mrb[0].mxu1 }
 0x244   : > { %v1170_v12 = vpop.f32.mrb[1].mxu1 }
 0x24a   : > { %v1726_v10 = vpop.f32.mrb[0].mxu0 }
 0x24b   : > { %v2224_v9 = vadd.f32 %v1726_v10, %v1168_v6  ;;  %v1728_v48 = vpop.f32.mrb[1].mxu0 }
 0x24c   : > { %v2225_v49 = vadd.f32 %v1728_v48, %v1170_v12  ;;  %v1947_v12 = vpop.permute.xlu1 %1946 }
 0x24d   : > { %v1753_v50 = vadd.f32 %v2224_v9, %v1746_v4 }
 0x24e   : > { %v1754_v52 = vadd.f32 %v2225_v49, %v1746_v4  ;;  %v1732_v55 = vpop.f32.mrb[2].mxu0 }
 0x24f   : > { %vm1757_vm6 = vcmp.gt.f32.partialorder %v1753_v50, 0.0  ;;  %v1761_v56 = vmul.f32 0.3, %v1753_v50  ;;  %v1264_v60 = vpop.f32.mrb[2].mxu1  ;;  %v1734_v53 = vpop.f32.mrb[3].mxu0 }
 0x250   : > { %vm1758_vm7 = vcmp.gt.f32.partialorder %v1754_v52, 0.0  ;;  %v1762_v54 = vmul.f32 0.3, %v1754_v52  ;;  %v2226_v61 = vadd.f32 %v1732_v55, %v1264_v60  ;;  %v1266_v62 = vpop.f32.mrb[3].mxu1 }
 0x251   : > { %v1765_v58 = vsel %vm1757_vm6, %v1753_v50, %v1761_v56  ;;  %v2227_v0 = vadd.f32 %v1734_v53, %v1266_v62  ;;  %v1883_v50 = vpop.permute.xlu0 %1882 }
 0x252   : > { %v1766_v16 = vsel %vm1758_vm7, %v1754_v52, %v1762_v54  ;;  %v1755_v3 = vadd.f32 %v2226_v61, %v1751_v63  ;;  %v1778_v5 = vrot.slane %v1765_v58, %v2596_v17  ;;  %v1792_v15 = vrot.slane %v1765_v58, %v2600_v19 }
 0x253   : > { %v1782_v21 = vrot.slane %v1766_v16, %v2596_v17  ;;  %v1796_v7 = vrot.slane %v1766_v16, %v2600_v19  ;;  %v1808_v13 = vrot.slane %v1765_v58, %v2605_v22  ;;  %v1812_v24 = vrot.slane %v1766_v16, %v2605_v22 }
 0x254   : > { %v1783_v25 = vmul.f32 %v1778_v5, %v1773_v46  ;;  %v1797_v26 = vmul.f32 %v1792_v15, %v1787_v45  ;;  %vm1759_vm8 = vcmp.gt.f32.partialorder %v1755_v3, 0.0  ;;  %v1763_v29 = vmul.f32 0.3, %v1755_v3 }
 0x255   : > { %v1784_v32 = vmul.f32 %v1782_v21, %v1773_v46  ;;  %v1798_v14 = vmul.f32 %v1796_v7, %v1787_v45  ;;  %v1813_v35 = vmul.f32 %v1808_v13, %v1803_v11  ;;  %v1824_v37 = vrot.slane %v1765_v58, %v2613_v30 }
 0x256   : > { %v1799_v34 = vadd.f32 %v1797_v26, %v1783_v25  ;;  %v1828_v38 = vrot.slane %v1766_v16, %v2613_v30  ;;  %v1814_v59 = vmul.f32 %v1812_v24, %v1803_v11  ;;  %v1840_v41 = vrot.slane %v1765_v58, %v2598_v18  ;;  %v1931_v24 = vpop.permute.xlu0 %1930 }
 0x257   : > { %v1800_v39 = vadd.f32 %v1798_v14, %v1784_v32  ;;  %v1844_v42 = vrot.slane %v1766_v16, %v2598_v18  ;;  %v1829_v43 = vmul.f32 %v1824_v37, %v1819_v36  ;;  %v1856_v40 = vrot.slane %v1765_v58, %v2602_v20 }
 0x258   : > { %v1815_v57 = vadd.f32 %v1813_v35, %v1799_v34  ;;  %v2910_v44 = vsel %vm1759_vm8, %v1755_v3, %v1763_v29  ;;  %v1830_v28 = vmul.f32 %v1828_v38, %v1819_v36  ;;  %v1845_v46 = vmul.f32 %v1840_v41, %v1835_v47 }
 0x259   : > { %v1816_v33 = vadd.f32 %v1814_v59, %v1800_v39  ;;  %v1860_v45 = vrot.slane %v1766_v16, %v2602_v20  ;;  %v1872_v6 = vrot.slane %v1765_v58, %v2607_v23  ;;  %v1846_v10 = vmul.f32 %v1844_v42, %v1835_v47 }
 0x25a   : > { %v1831_v2 = vadd.f32 %v1829_v43, %v1815_v57  ;;  %v1876_v11 = vrot.slane %v1766_v16, %v2607_v23  ;;  %v1888_v9 = vrot.slane %v1765_v58, %v2615_v31  ;;  %v1861_v49 = vmul.f32 %v1856_v40, %v2891_v1  ;;  %v1979_v40 = vpop.permute.xlu0 %1978 }
 0x25b   : > { %v1832_v4 = vadd.f32 %v1830_v28, %v1816_v33  ;;  %v1862_v36 = vmul.f32 %v1860_v45, %v2891_v1  ;;  %v1892_v55 = vrot.slane %v1766_v16, %v2615_v31  ;;  %v1877_v60 = vmul.f32 %v1872_v6, %v2893_v8  ;;  %v1963_v1 = vpop.permute.xlu1 %1962 }
 0x25c   : > { %v1847_v48 = vadd.f32 %v1845_v46, %v1831_v2  ;;  %v1904_v53 = vrot.slane %v2910_v44, %v2596_v17  ;;  %v1756_v47 = vadd.f32 %v2227_v0, %v1751_v63  ;;  %v1878_v61 = vmul.f32 %v1876_v11, %v2893_v8 }
 0x25d   : > { %v1848_v52 = vadd.f32 %v1846_v10, %v1832_v4  ;;  %v1893_v62 = vmul.f32 %v1888_v9, %v1883_v50  ;;  %v1920_v5 = vrot.slane %v2910_v44, %v2600_v19  ;;  %v1894_v16 = vmul.f32 %v1892_v55, %v1883_v50 }
 0x25e   : > { %v1863_v56 = vadd.f32 %v1861_v49, %v1847_v48  ;;  %vm1760_vm9 = vcmp.gt.f32.partialorder %v1756_v47, 0.0  ;;  %v1764_v3 = vmul.f32 0.3, %v1756_v47  ;;  %v1909_v7 = vmul.f32 %v1904_v53, %v2895_v51 }
 0x25f   : > { %v1864_v54 = vadd.f32 %v1862_v36, %v1848_v52  ;;  %v1936_v63 = vrot.slane %v2910_v44, %v2605_v22  ;;  %v1925_v29 = vmul.f32 %v1920_v5, %v2903_v27  ;;  %v1952_v32 = vrot.slane %v2910_v44, %v2613_v30  ;;  %v1995_v39 = vpop.permute.xlu1 %1994 }
 0x260   : > { %v1879_v58 = vadd.f32 %v1877_v60, %v1863_v56  ;;  %v1768_v13 = vsel %vm1760_vm9, %v1756_v47, %v1764_v3  ;;  %v1968_v35 = vrot.slane %v2910_v44, %v2598_v18  ;;  %v1984_v57 = vrot.slane %v2910_v44, %v2602_v20  ;;  %v2029_v60 = vpop.permute.xlu0 %2028 }
 0x261   : > { %v1880_v15 = vadd.f32 %v1878_v61, %v1864_v54  ;;  %v1908_v8 = vrot.slane %v1768_v13, %v2596_v17  ;;  %v1924_v25 = vrot.slane %v1768_v13, %v2600_v19  ;;  %v1940_v34 = vrot.slane %v1768_v13, %v2605_v22 }
 0x262   : > { %v1895_v21 = vadd.f32 %v1893_v62, %v1879_v58  ;;  %v1941_v38 = vmul.f32 %v1936_v63, %v1931_v24  ;;  %v1956_v19 = vrot.slane %v1768_v13, %v2613_v30  ;;  %v1957_v42 = vmul.f32 %v1952_v32, %v1947_v12  ;;  %v2445_v58 = vld [vmem:[%s2594_s29] sm:$0xff] }
 0x263   : > { %v1896_v0 = vadd.f32 %v1894_v16, %v1880_v15  ;;  %v1910_v14 = vmul.f32 %v1908_v8, %v2895_v51  ;;  %v1926_v17 = vmul.f32 %v1924_v25, %v2903_v27  ;;  %v1942_v51 = vmul.f32 %v1940_v34, %v1931_v24  ;;  %v2011_v9 = vpop.permute.xlu1 %2010 }
 0x264   : > { %v1911_v26 = vadd.f32 %v1909_v7, %v1895_v21  ;;  %v1972_v22 = vrot.slane %v1768_v13, %v2598_v18  ;;  %v1973_v33 = vmul.f32 %v1968_v35, %v1963_v1  ;;  %v2000_v28 = vrot.slane %v2910_v44, %v2607_v23 }
 0x265   : > { %v1912_v59 = vadd.f32 %v1910_v14, %v1896_v0  ;;  %v1958_v45 = vmul.f32 %v1956_v19, %v1947_v12  ;;  %v1988_v27 = vrot.slane %v1768_v13, %v2602_v20  ;;  %v2016_v30 = vrot.slane %v2910_v44, %v2615_v31 }
 0x266   : > { %v1927_v37 = vadd.f32 %v1925_v29, %v1911_v26  ;;  %v1989_v4 = vmul.f32 %v1984_v57, %v1979_v40  ;;  %v2004_v10 = vrot.slane %v1768_v13, %v2607_v23  ;;  %v1974_v48 = vmul.f32 %v1972_v22, %v1963_v1 }
 0x267   : > { %v1928_v43 = vadd.f32 %v1926_v17, %v1912_v59  ;;  %v2005_v18 = vmul.f32 %v2000_v28, %v1995_v39  ;;  %v2020_v50 = vrot.slane %v1768_v13, %v2615_v31  ;;  %v1990_v36 = vmul.f32 %v1988_v27, %v1979_v40 }
 0x268   : > { %v1943_v41 = vadd.f32 %v1941_v38, %v1927_v37  ;;  %v2021_v12 = vmul.f32 %v2016_v30, %v2011_v9  ;;  %v2006_v20 = vmul.f32 %v2004_v10, %v1995_v39  ;;  %v2039_v3 = vcombine.high %v2445_v58, %v2445_v58 }
 0x269   : > { %v1944_v46 = vadd.f32 %v1942_v51, %v1928_v43  ;;  %v2022_v53 = vmul.f32 %v2020_v50, %v2011_v9 }
 0x26a   : > { %v1959_v2 = vadd.f32 %v1957_v42, %v1943_v41 }
 0x26b   : > { %v1960_v11 = vadd.f32 %v1958_v45, %v1944_v46 }
 0x26c   : > { %v1975_v6 = vadd.f32 %v1973_v33, %v1959_v2 }
 0x26d   : > { %v1976_v52 = vadd.f32 %v1974_v48, %v1960_v11 }
 0x26e   : > { %v1991_v49 = vadd.f32 %v1989_v4, %v1975_v6 }
 0x26f   : > { %v1992_v56 = vadd.f32 %v1990_v36, %v1976_v52 }
 0x270   : > { %v2007_v55 = vadd.f32 %v2005_v18, %v1991_v49 }
 0x271   : > { %v2008_v47 = vadd.f32 %v2006_v20, %v1992_v56 }
 0x272   : > { %v2023_v44 = vadd.f32 %v2021_v12, %v2007_v55 }
 0x273   : > { %v2024_v54 = vadd.f32 %v2022_v53, %v2008_v47 }
 0x274   : > { %v2031_v23 = vadd.f32 %v2029_v60, %v2023_v44 }
 0x275   : > { %v2032_v62 = vadd.f32 %v2029_v60, %v2024_v54 }
 0x276   : > { %vm2033_vm10 = vcmp.gt.f32.partialorder %v2031_v23, 0.0  ;;  %v2035_v61 = vmul.f32 0.3, %v2031_v23 }
 0x277   : > { %vm2034_vm11 = vcmp.gt.f32.partialorder %v2032_v62, 0.0  ;;  %v2036_v5 = vmul.f32 0.3, %v2032_v62 }
 0x278   : > { %v2037_v31 = vsel %vm2033_vm10, %v2031_v23, %v2035_v61 }
 0x279   : > { %v2041_v1 = vadd.f32 %v2445_v58, %v2037_v31  ;;  %v2038_v15 = vsel %vm2034_vm11, %v2032_v62, %v2036_v5 }
 0x27a   : > { %v2042_v16 = vadd.f32 %v2039_v3, %v2038_v15 }
 0x27c   : > { %v2045_v21 = vcombine.low %v2041_v1, %v2042_v16 }
 0x27e   : > { %2047 = vst [vmem:[%s332_s11] sm:$0xff] %v2045_v21 }
 0x27f PF: > { %s19_s30 = sadd.s32 1, %s2452_s30  }
 0x280   : > { %p16_p4 = scmp.ge.s32.totalorder %s19_s30, 4  }
 0x282   :  { %18 = sbr.rel (!%p16_p4) target bundleno = 1 (0x1), region = 94 }

</bundles_post_ra>
